<compile_context>
chip_gen: v5e
topology: v5e:2x2
jax: 0.10.0
libtpu: 0.0.40
codegen_flags: <defaults>
</compile_context>

<pallas_src>
import functools

import jax
import jax.numpy as jnp
from jax.experimental import pallas as pl
from jax.experimental.pallas import tpu as pltpu

_LANE = 128          # last tile dim should be a multiple of the lane width
_SUBLANE_BF16 = 16   # bf16 packs 16 rows per sublane tile


def _round_up(n, m):
    return ((n + m - 1) // m) * m


def _heads_kernel(x_ref,
                  gw1_ref, gb1_ref, gw2_ref, gb2_ref,
                  qw1_ref, qb1_ref, qw2_ref, qb2_ref,
                  z_ref, p_ref):
    """Fused Projector + Predictor for one (block_m, D) row tile.

      z = relu(relu(x @ Gw1 + Gb1) @ Gw2 + Gb2)
      p = relu(relu(z @ Qw1 + Qb1) @ Qw2 + Qb2)
    """
    # ---- Projector ----
    h1 = jnp.dot(x_ref[...], gw1_ref[...], preferred_element_type=jnp.float32)
    h1 = jnp.maximum(h1 + gb1_ref[...], 0.0)
    z = jnp.dot(h1.astype(jnp.bfloat16), gw2_ref[...],
                preferred_element_type=jnp.float32)
    z = jnp.maximum(z + gb2_ref[...], 0.0)
    z_ref[...] = z.astype(z_ref.dtype)

    # ---- Predictor (consumes z without leaving VMEM) ----
    h2 = jnp.dot(z.astype(jnp.bfloat16), qw1_ref[...],
                 preferred_element_type=jnp.float32)
    h2 = jnp.maximum(h2 + qb1_ref[...], 0.0)
    p = jnp.dot(h2.astype(jnp.bfloat16), qw2_ref[...],
                preferred_element_type=jnp.float32)
    p = jnp.maximum(p + qb2_ref[...], 0.0)
    p_ref[...] = p.astype(p_ref.dtype)


def _prep_weights(w1, b1, w2, b2, D, Dp):
    """bf16 weights (in,out layout), f32 row biases, lane-padded to Dp."""
    w1 = w1.astype(jnp.bfloat16)
    w2 = w2.astype(jnp.bfloat16)
    b1r = b1.astype(jnp.float32).reshape(1, D)
    b2r = b2.astype(jnp.float32).reshape(1, D)
    if Dp != D:
        pd = Dp - D
        w1 = jnp.pad(w1, ((0, pd), (0, pd)))
        w2 = jnp.pad(w2, ((0, pd), (0, pd)))
        b1r = jnp.pad(b1r, ((0, 0), (0, pd)))
        b2r = jnp.pad(b2r, ((0, 0), (0, pd)))
    return w1, b1r, w2, b2r


@functools.partial(jax.jit, static_argnames=("block_m",))
def theta_xi_heads_forward(h, g_params, q_params, *, block_m=512):
    """z = Projector(h); p = Predictor(z); returns (h, z, p).

    `h` stands in for the bilinearly-resized FeatureExtractor output,
    channels-last (..., fpn_dim) so the per-feature MLPs act on the last dim.
    Weights are stored (in, out) so the kernel computes x @ W (== x @ W^T in
    the PyTorch nn.Linear convention).
    """
    orig_shape = h.shape
    orig_dtype = h.dtype
    D = orig_shape[-1]
    x2d = h.reshape(-1, D)
    M = x2d.shape[0]

    # Lane-dense feature dim (zero padding is exact: padded hidden/output
    # columns are relu(0) = 0 and never mix into real columns).
    Dp = _round_up(D, _LANE)

    # bf16 MXU operands; accumulation / bias / ReLU stay f32 inside the kernel.
    x2d = x2d.astype(jnp.bfloat16)
    if Dp != D:
        x2d = jnp.pad(x2d, ((0, 0), (0, Dp - D)))
    gw1, gb1, gw2, gb2 = _prep_weights(*g_params, D, Dp)
    qw1, qb1, qw2, qb2 = _prep_weights(*q_params, D, Dp)

    # Row tiling: large tiles, bf16-sublane aligned, but keep >= 2 grid steps
    # when M allows so both v7x TensorCores are used.
    bm = max(_SUBLANE_BF16,
             min(block_m, _round_up(max(M // 2, 1), _SUBLANE_BF16)))
    Mp = _round_up(M, bm)
    if Mp != M:
        x2d = jnp.pad(x2d, ((0, Mp - M), (0, 0)))
    grid = (Mp // bm,)

    out_dtype = jnp.float32
    out_bytes = jnp.dtype(out_dtype).itemsize

    # Advisory cost estimate so XLA schedules neighbours sensibly.
    cost = pl.CostEstimate(
        flops=8 * Mp * Dp * Dp,                   # 4 matmuls of (Mp,Dp)x(Dp,Dp)
        transcendentals=0,
        bytes_accessed=(Mp * Dp * 2               # x (bf16), read once
                        + 2 * Mp * Dp * out_bytes  # z, p (f32)
                        + 4 * Dp * Dp * 2          # 4 weight matrices (bf16)
                        + 4 * Dp * 4))             # 4 biases (f32)

    # VMEM budget: resident weights/biases (default double-buffered) plus
    # double-buffered activation tiles; 2x margin, clamped v7x-safe (<=64MiB).
    vmem_est = (4 * Dp * Dp * 2 * 2               # 4 weights, bf16, 2 buffers
                + 4 * Dp * 4 * 2                  # 4 biases
                + 2 * bm * Dp * 2                 # x tile, 2 buffers
                + 2 * 2 * bm * Dp * out_bytes)    # z + p tiles, 2 buffers each
    vmem_limit = int(min(max(2 * vmem_est, 32 << 20), 64 << 20))

    weight_spec = pl.BlockSpec((Dp, Dp), lambda i: (0, 0))   # resident
    bias_spec = pl.BlockSpec((1, Dp), lambda i: (0, 0))      # resident
    row_spec = pl.BlockSpec((bm, Dp), lambda i: (i, 0))

    z2d, p2d = pl.pallas_call(
        _heads_kernel,
        out_shape=(jax.ShapeDtypeStruct((Mp, Dp), out_dtype),
                   jax.ShapeDtypeStruct((Mp, Dp), out_dtype)),
        grid_spec=pltpu.PrefetchScalarGridSpec(
            num_scalar_prefetch=0,
            grid=grid,
            in_specs=[
                row_spec,                         # x row tile
                weight_spec, bias_spec,           # Projector layer 1
                weight_spec, bias_spec,           # Projector layer 2
                weight_spec, bias_spec,           # Predictor layer 1
                weight_spec, bias_spec,           # Predictor layer 2
            ],
            out_specs=[row_spec, row_spec],
        ),
        compiler_params=pltpu.CompilerParams(
            dimension_semantics=("parallel",),
            vmem_limit_bytes=vmem_limit),
        cost_estimate=cost,
    )(x2d, gw1, gb1, gw2, gb2, qw1, qb1, qw2, qb2)

    z = z2d[:M, :D].astype(orig_dtype).reshape(orig_shape)
    p = p2d[:M, :D].astype(orig_dtype).reshape(orig_shape)
    return h, z, p


def _mlp_reference(x, w1, b1, w2, b2):
    # Matches the kernel numerics: bf16 operands, f32 accumulation.
    f32 = jnp.float32
    xb = x.astype(jnp.bfloat16).astype(f32)
    w1b = w1.astype(jnp.bfloat16).astype(f32)
    w2b = w2.astype(jnp.bfloat16).astype(f32)
    hid = jnp.maximum(xb @ w1b + b1.astype(f32), 0.0)
    hidb = hid.astype(jnp.bfloat16).astype(f32)
    return jnp.maximum(hidb @ w2b + b2.astype(f32), 0.0)


if __name__ == "__main__":
    fpn_dim = 256               # module default; lane-dense (multiple of 128)
    batch, hh, ww = 2, 8, 8     # small spatial stand-in for the 224x224 map

    key = jax.random.PRNGKey(0)
    kh, kg1, kg2, kg3, kg4, kq1, kq2, kq3, kq4 = jax.random.split(key, 9)

    # Stand-in for resize(FeatureExtractor(input)), channels-last.
    h = jax.random.normal(kh, (batch, hh, ww, fpn_dim), dtype=jnp.float32)

    bound = 1.0 / jnp.sqrt(fpn_dim)

    def init_linear(kw, kb):
        w = jax.random.uniform(kw, (fpn_dim, fpn_dim), jnp.float32,
                               -bound, bound)
        b = jax.random.uniform(kb, (fpn_dim,), jnp.float32, -bound, bound)
        return w, b

    g_w1, g_b1 = init_linear(kg1, kg2)
    g_w2, g_b2 = init_linear(kg3, kg4)
    q_w1, q_b1 = init_linear(kq1, kq2)
    q_w2, q_b2 = init_linear(kq3, kq4)

    g_params = (g_w1, g_b1, g_w2, g_b2)
    q_params = (q_w1, q_b1, q_w2, q_b2)

    h_out, z, p = theta_xi_heads_forward(h, g_params, q_params)
    h_out, z, p = jax.block_until_ready((h_out, z, p))

    z_ref = _mlp_reference(h, *g_params)
    p_ref = _mlp_reference(z_ref, *q_params)

    assert h_out.shape == h.shape and z.shape == h.shape and p.shape == h.shape
    assert jnp.allclose(z, z_ref, atol=1e-2, rtol=1e-2)
    assert jnp.allclose(p, p_ref, atol=1e-2, rtol=1e-2)

    print("KERNEL_OK")
</pallas_src>

<mosaic_0001>
module attributes {stable_mosaic.version = 11 : i64} {
  func.func @_heads_kernel(%arg0: i32, %arg1: memref<64x256xbf16, #tpu.memory_space<vmem>>, %arg2: memref<256x256xbf16, #tpu.memory_space<vmem>>, %arg3: memref<1x256xf32, #tpu.memory_space<vmem>>, %arg4: memref<256x256xbf16, #tpu.memory_space<vmem>>, %arg5: memref<1x256xf32, #tpu.memory_space<vmem>>, %arg6: memref<256x256xbf16, #tpu.memory_space<vmem>>, %arg7: memref<1x256xf32, #tpu.memory_space<vmem>>, %arg8: memref<256x256xbf16, #tpu.memory_space<vmem>>, %arg9: memref<1x256xf32, #tpu.memory_space<vmem>>, %arg10: memref<64x256xf32, #tpu.memory_space<vmem>>, %arg11: memref<64x256xf32, #tpu.memory_space<vmem>>) attributes {dimension_semantics = [#tpu.dimension_semantics<parallel>], iteration_bounds = array<i64: 2>, scalar_prefetch = 0 : i64, scratch_operands = 0 : i64, tpu.core_type = #tpu.core_type<tc>, window_params = [{transform_indices = @transform_0, window_bounds = array<i64: 64, 256>}, {pipeline_mode = #tpu.pipeline_mode<synchronous>, transform_indices = @transform_1, window_bounds = array<i64: 256, 256>}, {pipeline_mode = #tpu.pipeline_mode<synchronous>, transform_indices = @transform_2, window_bounds = array<i64: 1, 256>}, {pipeline_mode = #tpu.pipeline_mode<synchronous>, transform_indices = @transform_3, window_bounds = array<i64: 256, 256>}, {pipeline_mode = #tpu.pipeline_mode<synchronous>, transform_indices = @transform_4, window_bounds = array<i64: 1, 256>}, {pipeline_mode = #tpu.pipeline_mode<synchronous>, transform_indices = @transform_5, window_bounds = array<i64: 256, 256>}, {pipeline_mode = #tpu.pipeline_mode<synchronous>, transform_indices = @transform_6, window_bounds = array<i64: 1, 256>}, {pipeline_mode = #tpu.pipeline_mode<synchronous>, transform_indices = @transform_7, window_bounds = array<i64: 256, 256>}, {pipeline_mode = #tpu.pipeline_mode<synchronous>, transform_indices = @transform_8, window_bounds = array<i64: 1, 256>}, {transform_indices = @transform_9, window_bounds = array<i64: 64, 256>}, {transform_indices = @transform_10, window_bounds = array<i64: 64, 256>}]} {
    %c0 = arith.constant 0 : index
    %c0_0 = arith.constant 0 : index
    %0 = vector.load %arg1[%c0, %c0_0] : memref<64x256xbf16, #tpu.memory_space<vmem>>, vector<64x256xbf16>
    %c0_1 = arith.constant 0 : index
    %c0_2 = arith.constant 0 : index
    %1 = vector.load %arg2[%c0_1, %c0_2] : memref<256x256xbf16, #tpu.memory_space<vmem>>, vector<256x256xbf16>
    %cst = arith.constant dense<0.000000e+00> : vector<64x256xf32>
    %2 = tpu.matmul %0, %1, %cst {dimension_numbers = #tpu.dot_dimension_numbers<[1], [0], [0], [1], [0, 0, 1, 1], [], []>} : vector<64x256xbf16>, vector<256x256xbf16>, vector<64x256xf32> -> vector<64x256xf32>
    %c0_3 = arith.constant 0 : index
    %c0_4 = arith.constant 0 : index
    %3 = vector.load %arg3[%c0_3, %c0_4] : memref<1x256xf32, #tpu.memory_space<vmem>>, vector<1x256xf32>
    %4 = vector.broadcast %3 : vector<1x256xf32> to vector<64x256xf32>
    %5 = arith.addf %2, %4 : vector<64x256xf32>
    %cst_5 = arith.constant 0.000000e+00 : f32
    %6 = vector.broadcast %cst_5 : f32 to vector<64x256xf32>
    %7 = arith.maximumf %5, %6 : vector<64x256xf32>
    %8 = arith.truncf %7 : vector<64x256xf32> to vector<64x256xbf16>
    %c0_6 = arith.constant 0 : index
    %c0_7 = arith.constant 0 : index
    %9 = vector.load %arg4[%c0_6, %c0_7] : memref<256x256xbf16, #tpu.memory_space<vmem>>, vector<256x256xbf16>
    %cst_8 = arith.constant dense<0.000000e+00> : vector<64x256xf32>
    %10 = tpu.matmul %8, %9, %cst_8 {dimension_numbers = #tpu.dot_dimension_numbers<[1], [0], [0], [1], [0, 0, 1, 1], [], []>} : vector<64x256xbf16>, vector<256x256xbf16>, vector<64x256xf32> -> vector<64x256xf32>
    %c0_9 = arith.constant 0 : index
    %c0_10 = arith.constant 0 : index
    %11 = vector.load %arg5[%c0_9, %c0_10] : memref<1x256xf32, #tpu.memory_space<vmem>>, vector<1x256xf32>
    %12 = vector.broadcast %11 : vector<1x256xf32> to vector<64x256xf32>
    %13 = arith.addf %10, %12 : vector<64x256xf32>
    %cst_11 = arith.constant 0.000000e+00 : f32
    %14 = vector.broadcast %cst_11 : f32 to vector<64x256xf32>
    %15 = arith.maximumf %13, %14 : vector<64x256xf32>
    %c0_12 = arith.constant 0 : index
    %c0_13 = arith.constant 0 : index
    %16 = vector.load %arg10[%c0_12, %c0_13] : memref<64x256xf32, #tpu.memory_space<vmem>>, vector<64x256xf32>
    tpu.vector_store %arg10[%c0_12, %c0_13], %15 {strides = array<i32>} : memref<64x256xf32, #tpu.memory_space<vmem>>, vector<64x256xf32>,
    %17 = arith.truncf %15 : vector<64x256xf32> to vector<64x256xbf16>
    %c0_14 = arith.constant 0 : index
    %c0_15 = arith.constant 0 : index
    %18 = vector.load %arg6[%c0_14, %c0_15] : memref<256x256xbf16, #tpu.memory_space<vmem>>, vector<256x256xbf16>
    %cst_16 = arith.constant dense<0.000000e+00> : vector<64x256xf32>
    %19 = tpu.matmul %17, %18, %cst_16 {dimension_numbers = #tpu.dot_dimension_numbers<[1], [0], [0], [1], [0, 0, 1, 1], [], []>} : vector<64x256xbf16>, vector<256x256xbf16>, vector<64x256xf32> -> vector<64x256xf32>
    %c0_17 = arith.constant 0 : index
    %c0_18 = arith.constant 0 : index
    %20 = vector.load %arg7[%c0_17, %c0_18] : memref<1x256xf32, #tpu.memory_space<vmem>>, vector<1x256xf32>
    %21 = vector.broadcast %20 : vector<1x256xf32> to vector<64x256xf32>
    %22 = arith.addf %19, %21 : vector<64x256xf32>
    %cst_19 = arith.constant 0.000000e+00 : f32
    %23 = vector.broadcast %cst_19 : f32 to vector<64x256xf32>
    %24 = arith.maximumf %22, %23 : vector<64x256xf32>
    %25 = arith.truncf %24 : vector<64x256xf32> to vector<64x256xbf16>
    %c0_20 = arith.constant 0 : index
    %c0_21 = arith.constant 0 : index
    %26 = vector.load %arg8[%c0_20, %c0_21] : memref<256x256xbf16, #tpu.memory_space<vmem>>, vector<256x256xbf16>
    %cst_22 = arith.constant dense<0.000000e+00> : vector<64x256xf32>
    %27 = tpu.matmul %25, %26, %cst_22 {dimension_numbers = #tpu.dot_dimension_numbers<[1], [0], [0], [1], [0, 0, 1, 1], [], []>} : vector<64x256xbf16>, vector<256x256xbf16>, vector<64x256xf32> -> vector<64x256xf32>
    %c0_23 = arith.constant 0 : index
    %c0_24 = arith.constant 0 : index
    %28 = vector.load %arg9[%c0_23, %c0_24] : memref<1x256xf32, #tpu.memory_space<vmem>>, vector<1x256xf32>
    %29 = vector.broadcast %28 : vector<1x256xf32> to vector<64x256xf32>
    %30 = arith.addf %27, %29 : vector<64x256xf32>
    %cst_25 = arith.constant 0.000000e+00 : f32
    %31 = vector.broadcast %cst_25 : f32 to vector<64x256xf32>
    %32 = arith.maximumf %30, %31 : vector<64x256xf32>
    %c0_26 = arith.constant 0 : index
    %c0_27 = arith.constant 0 : index
    %33 = vector.load %arg11[%c0_26, %c0_27] : memref<64x256xf32, #tpu.memory_space<vmem>>, vector<64x256xf32>
    tpu.vector_store %arg11[%c0_26, %c0_27], %32 {strides = array<i32>} : memref<64x256xf32, #tpu.memory_space<vmem>>, vector<64x256xf32>,
    return
  }
  func.func @transform_0(%arg0: i32) -> (i32, i32) {
    %c0_i32 = arith.constant 0 : i32
    %c0_i32_0 = arith.constant 0 : i32
    return %arg0, %c0_i32 : i32, i32
  }
  func.func @transform_1(%arg0: i32) -> (i32, i32) {
    %c0_i32 = arith.constant 0 : i32
    %c0_i32_0 = arith.constant 0 : i32
    %c0_i32_1 = arith.constant 0 : i32
    return %c0_i32, %c0_i32_0 : i32, i32
  }
  func.func @transform_2(%arg0: i32) -> (i32, i32) {
    %c0_i32 = arith.constant 0 : i32
    %c0_i32_0 = arith.constant 0 : i32
    %c0_i32_1 = arith.constant 0 : i32
    return %c0_i32, %c0_i32_0 : i32, i32
  }
  func.func @transform_3(%arg0: i32) -> (i32, i32) {
    %c0_i32 = arith.constant 0 : i32
    %c0_i32_0 = arith.constant 0 : i32
    %c0_i32_1 = arith.constant 0 : i32
    return %c0_i32, %c0_i32_0 : i32, i32
  }
  func.func @transform_4(%arg0: i32) -> (i32, i32) {
    %c0_i32 = arith.constant 0 : i32
    %c0_i32_0 = arith.constant 0 : i32
    %c0_i32_1 = arith.constant 0 : i32
    return %c0_i32, %c0_i32_0 : i32, i32
  }
  func.func @transform_5(%arg0: i32) -> (i32, i32) {
    %c0_i32 = arith.constant 0 : i32
    %c0_i32_0 = arith.constant 0 : i32
    %c0_i32_1 = arith.constant 0 : i32
    return %c0_i32, %c0_i32_0 : i32, i32
  }
  func.func @transform_6(%arg0: i32) -> (i32, i32) {
    %c0_i32 = arith.constant 0 : i32
    %c0_i32_0 = arith.constant 0 : i32
    %c0_i32_1 = arith.constant 0 : i32
    return %c0_i32, %c0_i32_0 : i32, i32
  }
  func.func @transform_7(%arg0: i32) -> (i32, i32) {
    %c0_i32 = arith.constant 0 : i32
    %c0_i32_0 = arith.constant 0 : i32
    %c0_i32_1 = arith.constant 0 : i32
    return %c0_i32, %c0_i32_0 : i32, i32
  }
  func.func @transform_8(%arg0: i32) -> (i32, i32) {
    %c0_i32 = arith.constant 0 : i32
    %c0_i32_0 = arith.constant 0 : i32
    %c0_i32_1 = arith.constant 0 : i32
    return %c0_i32, %c0_i32_0 : i32, i32
  }
  func.func @transform_9(%arg0: i32) -> (i32, i32) {
    %c0_i32 = arith.constant 0 : i32
    %c0_i32_0 = arith.constant 0 : i32
    return %arg0, %c0_i32 : i32, i32
  }
  func.func @transform_10(%arg0: i32) -> (i32, i32) {
    %c0_i32 = arith.constant 0 : i32
    %c0_i32_0 = arith.constant 0 : i32
    return %arg0, %c0_i32 : i32, i32
  }
}

</mosaic_0001>

<bundles_post_ra>
// kernel: theta_xi_heads_forward.1
= control target key start
LH: loop header
LB: loop body
LE: loop exit
PB: predicated region body
PF: predicated region fallthrough
CT: control target
= control target key end

     0   :  { %s3877_s0 = inlined_call_operand.vmem [shape: bf16[128,256], index: 0, kind: input, shape index: {}]   ;;  %s3878_s1 = inlined_call_operand.vmem [shape: bf16[256,256], index: 1, kind: input, shape index: {}]   ;;  %s3879_s2 = inlined_call_operand.vmem [shape: f32[1,256], index: 2, kind: input, shape index: {}]   ;;  %s3880_s3 = inlined_call_operand.vmem [shape: bf16[256,256], index: 3, kind: input, shape index: {}]   ;;  %s3881_s4 = inlined_call_operand.vmem [shape: f32[1,256], index: 4, kind: input, shape index: {}]   ;;  %s3882_s5 = inlined_call_operand.vmem [shape: bf16[256,256], index: 5, kind: input, shape index: {}]   ;;  %s3883_s6 = inlined_call_operand.vmem [shape: f32[1,256], index: 6, kind: input, shape index: {}]   ;;  %s3884_s7 = inlined_call_operand.vmem [shape: bf16[256,256], index: 7, kind: input, shape index: {}]   ;;  %s3885_s8 = inlined_call_operand.vmem [shape: f32[1,256], index: 8, kind: input, shape index: {}]   ;;  %s3886_s9 = inlined_call_operand.hbm [shape: f32[128,256], index: 9, kind: output, shape index: {0}]   ;;  %s3887_s10 = inlined_call_operand.hbm [shape: f32[128,256], index: 10, kind: output, shape index: {1}]  }
   0x1   :  { %3889 = sst [smem:[#allocation9_spill]] %s3877_s0 }
   0x2   :  { %3890 = sst [smem:[#allocation10_spill]] %s3878_s1 }
   0x3   :  { %3891 = sst [smem:[#allocation11_spill]] %s3879_s2 }
   0x4   :  { %3892 = sst [smem:[#allocation12_spill]] %s3880_s3 }
   0x5   :  { %16 = vsyncpa [#allocation3], 0 }
   0x6   :  { %18 = vsyncpa [#allocation3 + $0x1], 0 }
   0x7   :  { %19 = vsyncpa [#allocation5], 0 }
   0x8   :  { %21 = vsyncpa [#allocation5 + $0x1], 0  ;;  %s2838_s13 = smov 0   ;;  %s2840_s14 = smov 0  }
   0x9   :  { %s2842_s15 = smov 0   ;;  %s2844_s16 = smov 0  }
   0xa LB: > { %s2859_s17 = sadd.s32 4294967295, %s2779_s16   ;;  %s1935_s18 = sadd.s32 4294967294, %s2779_s16   ;;  %s2779_s16 = sphi %s2844_s16, %s3905_s16   ;;  %s2775_s15 = sphi %s2842_s15, %s3904_s15   ;;  %s2771_s14 = sphi %s2840_s14, %s3903_s14   ;;  %s2767_s13 = sphi %s2838_s13, %s3902_s13  }
   0xb   : > { %s2863_s19 = sadd.s32 1, %s2779_s16   ;;  %s228_s20 = sadd.s32 1, %s2775_s15 }
   0xc   : > { %s225_s21 = ssub.s32 %s2779_s16, %s2863_s19  ;;  %p238_p0 = scmp.ne.s32.totalorder %s2775_s15, %s2771_s14 }
   0xd   : > { %p226_p1 = scmp.eq.s32.totalorder %s225_s21, 0  ;;  %p239_p2 = scmp.eq.s32.totalorder %s2859_s17, 1 }
   0xe   : > { %p244_p3 = scmp.ne.s32.totalorder %s2771_s14, %s2767_s13  ;;  %p245_p4 = scmp.eq.s32.totalorder %s1935_s18, 1 }
   0xf   : > { %s2874_s22 = scalar_select %p226_p1, %s2775_s15, %s228_s20  }
  0x10   : > { %p2876_p5 = por %p239_p2, %p238_p0  ;;  %p2880_p6 = por %p245_p4, %p244_p3 }
  0x11   : > { %3893 = sst [smem:[#allocation8_spill]] %s2874_s22  ;;  %p1938_p7 = scmp.ge.s32.totalorder %s2779_s16, 1 }
  0x12   : > { %p323_p8 = scmp.lt.s32.totalorder %s2779_s16, 3 }
  0x14   : > { %p324_p9 = pnand %p1938_p7, %p323_p8 }
  0x15   : > { %s3896_s1 = sld [smem:[#allocation10_spill]] (!%p324_p9)  ;;  %s1941_s20 = sshll.u32 (!%p324_p9), %s2859_s17, 3 }
  0x16   : > { %327 = sbr.rel (%p324_p9) target bundleno = 697 (0x2b9), region = 56  ;;  %p368_p10 = scmp.lt.s32.totalorder (!%p324_p9), %s1941_s20, 15 }
  0x17   : > { %s3897_s0 = sld [smem:[#allocation9_spill]] (!%p324_p9)  ;;  %s3513_s29 = sand.u32 (!%p324_p9), 1, %s2771_s14  }
  0x18   : > { %s3898_s3 = sld [smem:[#allocation12_spill]] (!%p324_p9)  ;;  %s3888_s30 = sshll.u32 (!%p324_p9), %s3513_s29, 7 }
  0x19   : > { %s3899_s2 = sld [smem:[#allocation11_spill]] (!%p324_p9)  ;;  %s1801_s12 = scalar_lea.sflag (!%p324_p9), [#allocation3], %s3513_s29 }
  0x1b   : > { %v2034_v0 = vld [vmem:[%s3896_s1 + $0x70] sm:$0xf]  ;;  %v2522_v1 = vld [vmem:[%s3896_s1 + $0x74] sm:$0xf0]  ;;  %v2521_v5 = vld [vmem:[%s3896_s1 + $0x74] sm:$0xf] }
  0x1c   : > { %v2098_v2 = vld [vmem:[%s3896_s1 + $0xf0] sm:$0xf]  ;;  %v2035_v3 = vor.u32 %v2522_v1, %v2034_v0  ;;  %v2538_v4 = vld [vmem:[%s3896_s1 + $0xf4] sm:$0xf0]  ;;  %v2036_v6 = vld [vmem:[%s3896_s1 + $0x78] sm:$0xf0] }
  0x1d   : > { %v2099_v7 = vor.u32 %v2538_v4, %v2098_v2  ;;  %v2039_v8 = vor.u32 %v2521_v5, %v2036_v6  ;;  %v2537_v9 = vld [vmem:[%s3896_s1 + $0xf4] sm:$0xf]  ;;  %v2100_v10 = vld [vmem:[%s3896_s1 + $0xf8] sm:$0xf0]  ;;  %v2026_v11 = vld [vmem:[%s3896_s1 + $0x60] sm:$0xf] }
  0x1e   : > { %622 = vmatpush.bf16.msra.mxu0 %v2035_v3  ;;  %v2103_v12 = vor.u32 %v2537_v9, %v2100_v10  ;;  %v2520_v13 = vld [vmem:[%s3896_s1 + $0x64] sm:$0xf0]  ;;  %v2090_v14 = vld [vmem:[%s3896_s1 + $0xe0] sm:$0xf]  ;;  %v2519_v18 = vld [vmem:[%s3896_s1 + $0x64] sm:$0xf] }
  0x1f   : > { %v2536_v15 = vld [vmem:[%s3896_s1 + $0xe4] sm:$0xf0]  ;;  %651 = vmatpush.bf16.msra.mxu1 %v2099_v7  ;;  %680 = vmatpush.bf16.msra.mxu2 %v2039_v8  ;;  %v2027_v16 = vor.u32 %v2520_v13, %v2026_v11  ;;  %v2028_v19 = vld [vmem:[%s3896_s1 + $0x68] sm:$0xf0]  ;;  %v2535_v20 = vld [vmem:[%s3896_s1 + $0xe4] sm:$0xf] }
  0x20   : > { %v2091_v17 = vor.u32 %v2536_v15, %v2090_v14  ;;  %709 = vmatpush.bf16.msra.mxu3 %v2103_v12  ;;  %v2031_v21 = vor.u32 %v2519_v18, %v2028_v19  ;;  %v2092_v22 = vld [vmem:[%s3896_s1 + $0xe8] sm:$0xf0]  ;;  %v2018_v23 = vld [vmem:[%s3896_s1 + $0x50] sm:$0xf]  ;;  %v2518_v24 = vld [vmem:[%s3896_s1 + $0x54] sm:$0xf0] }
  0x21   : > { %v2095_v25 = vor.u32 %v2535_v20, %v2092_v22  ;;  %v2082_v26 = vld [vmem:[%s3896_s1 + $0xd0] sm:$0xf]  ;;  %v2534_v27 = vld [vmem:[%s3896_s1 + $0xd4] sm:$0xf0]  ;;  %v2517_v28 = vld [vmem:[%s3896_s1 + $0x54] sm:$0xf]  ;;  %v2019_v29 = vor.u32 %v2518_v24, %v2018_v23 }
  0x22   : > { %623 = vmatpush.bf16.msra.mxu0 %v2027_v16  ;;  %v2020_v30 = vld [vmem:[%s3896_s1 + $0x58] sm:$0xf0]  ;;  %v2533_v31 = vld [vmem:[%s3896_s1 + $0xd4] sm:$0xf]  ;;  %v2083_v33 = vor.u32 %v2534_v27, %v2082_v26  ;;  %v2010_v35 = vld [vmem:[%s3896_s1 + $0x40] sm:$0xf] }
  0x23   : > { %v2084_v32 = vld [vmem:[%s3896_s1 + $0xd8] sm:$0xf0]  ;;  %652 = vmatpush.bf16.msra.mxu1 %v2091_v17  ;;  %681 = vmatpush.bf16.msra.mxu2 %v2031_v21  ;;  %v2023_v34 = vor.u32 %v2517_v28, %v2020_v30  ;;  %v2516_v36 = vld [vmem:[%s3896_s1 + $0x44] sm:$0xf0]  ;;  %v2074_v37 = vld [vmem:[%s3896_s1 + $0xc0] sm:$0xf] }
  0x24   : > { %710 = vmatpush.bf16.msra.mxu3 %v2095_v25  ;;  %v2087_v38 = vor.u32 %v2533_v31, %v2084_v32  ;;  %v2532_v39 = vld [vmem:[%s3896_s1 + $0xc4] sm:$0xf0]  ;;  %v2515_v40 = vld [vmem:[%s3896_s1 + $0x44] sm:$0xf]  ;;  %v2012_v41 = vld [vmem:[%s3896_s1 + $0x48] sm:$0xf0]  ;;  %v2011_v44 = vor.u32 %v2516_v36, %v2010_v35 }
  0x25   : > { %v2531_v42 = vld [vmem:[%s3896_s1 + $0xc4] sm:$0xf]  ;;  %v2076_v43 = vld [vmem:[%s3896_s1 + $0xc8] sm:$0xf0]  ;;  %v2075_v45 = vor.u32 %v2532_v39, %v2074_v37  ;;  %v2015_v46 = vor.u32 %v2515_v40, %v2012_v41  ;;  %v2002_v47 = vld [vmem:[%s3896_s1 + $0x30] sm:$0xf] }
  0x26   : > { %624 = vmatpush.bf16.msra.mxu0 %v2019_v29  ;;  %v2514_v48 = vld [vmem:[%s3896_s1 + $0x34] sm:$0xf0]  ;;  %v2066_v49 = vld [vmem:[%s3896_s1 + $0xb0] sm:$0xf]  ;;  %v2079_v50 = vor.u32 %v2531_v42, %v2076_v43  ;;  %v2513_v52 = vld [vmem:[%s3896_s1 + $0x34] sm:$0xf] }
  0x27   : > { %653 = vmatpush.bf16.msra.mxu1 %v2083_v33  ;;  %682 = vmatpush.bf16.msra.mxu2 %v2023_v34  ;;  %v2530_v51 = vld [vmem:[%s3896_s1 + $0xb4] sm:$0xf0]  ;;  %v2004_v53 = vld [vmem:[%s3896_s1 + $0x38] sm:$0xf0]  ;;  %v2529_v54 = vld [vmem:[%s3896_s1 + $0xb4] sm:$0xf]  ;;  %v2003_v56 = vor.u32 %v2514_v48, %v2002_v47 }
  0x28   : > { %711 = vmatpush.bf16.msra.mxu3 %v2087_v38  ;;  %v2068_v55 = vld [vmem:[%s3896_s1 + $0xb8] sm:$0xf0]  ;;  %v2067_v57 = vor.u32 %v2530_v51, %v2066_v49  ;;  %v2007_v58 = vor.u32 %v2513_v52, %v2004_v53  ;;  %v1994_v59 = vld [vmem:[%s3896_s1 + $0x20] sm:$0xf]  ;;  %v2512_v60 = vld [vmem:[%s3896_s1 + $0x24] sm:$0xf0] }
  0x29   : > { %v2058_v61 = vld [vmem:[%s3896_s1 + $0xa0] sm:$0xf]  ;;  %v2071_v62 = vor.u32 %v2529_v54, %v2068_v55  ;;  %v2528_v63 = vld [vmem:[%s3896_s1 + $0xa4] sm:$0xf0]  ;;  %v2511_v0 = vld [vmem:[%s3896_s1 + $0x24] sm:$0xf]  ;;  %v1995_v4 = vor.u32 %v2512_v60, %v1994_v59 }
  0x2a   : > { %625 = vmatpush.bf16.msra.mxu0 %v2011_v44  ;;  %v1996_v1 = vld [vmem:[%s3896_s1 + $0x28] sm:$0xf0]  ;;  %v2527_v2 = vld [vmem:[%s3896_s1 + $0xa4] sm:$0xf]  ;;  %v1986_v5 = vld [vmem:[%s3896_s1 + $0x10] sm:$0xf]  ;;  %v2059_v6 = vor.u32 %v2528_v63, %v2058_v61 }
  0x2b   : > { %654 = vmatpush.bf16.msra.mxu1 %v2075_v45  ;;  %683 = vmatpush.bf16.msra.mxu2 %v2015_v46  ;;  %v2060_v3 = vld [vmem:[%s3896_s1 + $0xa8] sm:$0xf0]  ;;  %v1999_v7 = vor.u32 %v2511_v0, %v1996_v1  ;;  %v2510_v8 = vld [vmem:[%s3896_s1 + $0x14] sm:$0xf0]  ;;  %v2050_v9 = vld [vmem:[%s3896_s1 + $0x90] sm:$0xf] }
  0x2c   : > { %712 = vmatpush.bf16.msra.mxu3 %v2079_v50  ;;  %v2526_v10 = vld [vmem:[%s3896_s1 + $0x94] sm:$0xf0]  ;;  %v2063_v11 = vor.u32 %v2527_v2, %v2060_v3  ;;  %v2509_v12 = vld [vmem:[%s3896_s1 + $0x14] sm:$0xf]  ;;  %v1988_v13 = vld [vmem:[%s3896_s1 + $0x18] sm:$0xf0]  ;;  %v1987_v16 = vor.u32 %v2510_v8, %v1986_v5 }
  0x2d   : > { %v2525_v14 = vld [vmem:[%s3896_s1 + $0x94] sm:$0xf]  ;;  %v2052_v15 = vld [vmem:[%s3896_s1 + $0x98] sm:$0xf0]  ;;  %v1978_v17 = vld [vmem:[%s3896_s1] sm:$0xf]  ;;  %v2051_v18 = vor.u32 %v2526_v10, %v2050_v9  ;;  %v1991_v19 = vor.u32 %v2509_v12, %v1988_v13 }
  0x2e   : > { %626 = vmatpush.bf16.msra.mxu0 %v2003_v56  ;;  %v2508_v20 = vld [vmem:[%s3896_s1 + $0x4] sm:$0xf0]  ;;  %v2042_v21 = vld [vmem:[%s3896_s1 + $0x80] sm:$0xf]  ;;  %s3907_s20 = smov (!%p368_p10, %s1941_s20), 15  ;;  %v2055_v22 = vor.u32 %v2525_v14, %v2052_v15 }
  0x2f   : > { %655 = vmatpush.bf16.msra.mxu1 %v2067_v57  ;;  %684 = vmatpush.bf16.msra.mxu2 %v2007_v58  ;;  %v2524_v23 = vld [vmem:[%s3896_s1 + $0x84] sm:$0xf0]  ;;  %v2507_v24 = vld [vmem:[%s3896_s1 + $0x4] sm:$0xf]  ;;  %v1980_v25 = vld [vmem:[%s3896_s1 + $0x8] sm:$0xf0]  ;;  %v1979_v28 = vor.u32 %v2508_v20, %v1978_v17 }
  0x30   : > { %713 = vmatpush.bf16.msra.mxu3 %v2071_v62  ;;  %v2523_v26 = vld [vmem:[%s3896_s1 + $0x84] sm:$0xf]  ;;  %v2044_v27 = vld [vmem:[%s3896_s1 + $0x88] sm:$0xf0]  ;;  %s2498_s22 = sshll.u32 %s3907_s20, 3  ;;  %v2043_v29 = vor.u32 %v2524_v23, %v2042_v21  ;;  %v1983_v30 = vor.u32 %v2507_v24, %v1980_v25  ;;  %s2705_s1 = scalar_lea.hbm %s3886_s9, 256 }
  0x31   : > { %s3082_s26 = scalar_lea.vmem %s3897_s0, %s2498_s22  ;;  %v2047_v34 = vor.u32 %v2523_v26, %v2044_v27  ;;  %v2553_v44 = vld [vmem:[%s3898_s3 + $0x74] sm:$0xf]  ;;  %v2164_v45 = vld [vmem:[%s3898_s3 + $0x78] sm:$0xf0]  ;;  %v2162_v49 = vld [vmem:[%s3898_s3 + $0x70] sm:$0xf] }
  0x32   : > { %627 = vmatpush.bf16.msra.mxu0 %v1995_v4  ;;  %v1946_v31 = vld [vmem:[%s3082_s26] sm:$0xf]  ;;  %v2500_v32 = vld [vmem:[%s3082_s26 + $0x4] sm:$0xf0]  ;;  %v2499_v33 = vld [vmem:[%s3082_s26 + $0x4] sm:$0xf]  ;;  %v2167_v47 = vor.u32 %v2553_v44, %v2164_v45 }
  0x33   : > { %656 = vmatpush.bf16.msra.mxu1 %v2059_v6  ;;  %685 = vmatpush.bf16.msra.mxu2 %v1999_v7  ;;  %v1948_v35 = vld [vmem:[%s3082_s26 + $0x8] sm:$0xf0]  ;;  %v1947_v36 = vor.u32 %v2500_v32, %v1946_v31  ;;  %v1954_v38 = vld [vmem:[%s3082_s26 + $0x10] sm:$0xf]  ;;  %v2502_v39 = vld [vmem:[%s3082_s26 + $0x14] sm:$0xf0] }
  0x34   : > { %714 = vmatpush.bf16.msra.mxu3 %v2063_v11  ;;  %v1951_v37 = vor.u32 %v2499_v33, %v1948_v35  ;;  %v2501_v40 = vld [vmem:[%s3082_s26 + $0x14] sm:$0xf]  ;;  %v1956_v41 = vld [vmem:[%s3082_s26 + $0x18] sm:$0xf0]  ;;  %v1955_v42 = vor.u32 %v2502_v39, %v1954_v38  ;;  %v2554_v50 = vld [vmem:[%s3898_s3 + $0x74] sm:$0xf0] }
  0x35   : > { %v1959_v43 = vor.u32 %v2501_v40, %v1956_v41  ;;  %v2569_v46 = vld [vmem:[%s3898_s3 + $0xf4] sm:$0xf]  ;;  %v2228_v48 = vld [vmem:[%s3898_s3 + $0xf8] sm:$0xf0]  ;;  %v2163_v52 = vor.u32 %v2554_v50, %v2162_v49  ;;  %v2226_v53 = vld [vmem:[%s3898_s3 + $0xf0] sm:$0xf] }
  0x36   : > { %628 = vmatpush.bf16.msra.mxu0 %v1987_v16  ;;  %v2231_v51 = vor.u32 %v2569_v46, %v2228_v48  ;;  %v2570_v54 = vld [vmem:[%s3898_s3 + $0xf4] sm:$0xf0]  ;;  %v2551_v55 = vld [vmem:[%s3898_s3 + $0x64] sm:$0xf]  ;;  %v2156_v57 = vld [vmem:[%s3898_s3 + $0x68] sm:$0xf0] }
  0x37   : > { %657 = vmatpush.bf16.msra.mxu1 %v2051_v18  ;;  %686 = vmatpush.bf16.msra.mxu2 %v1991_v19  ;;  %v2227_v56 = vor.u32 %v2570_v54, %v2226_v53  ;;  %v2567_v58 = vld [vmem:[%s3898_s3 + $0xe4] sm:$0xf]  ;;  %v2220_v59 = vld [vmem:[%s3898_s3 + $0xe8] sm:$0xf0]  ;;  %v2159_v60 = vor.u32 %v2551_v55, %v2156_v57  ;;  %v2154_v62 = vld [vmem:[%s3898_s3 + $0x60] sm:$0xf] }
  0x38   : > { %715 = vmatpush.bf16.msra.mxu3 %v2055_v22  ;;  %v2223_v61 = vor.u32 %v2567_v58, %v2220_v59  ;;  %v2552_v63 = vld [vmem:[%s3898_s3 + $0x64] sm:$0xf0]  ;;  %v2218_v0 = vld [vmem:[%s3898_s3 + $0xe0] sm:$0xf]  ;;  %v2549_v5 = vld [vmem:[%s3898_s3 + $0x54] sm:$0xf] }
  0x39   : > { %v1962_v1 = vld [vmem:[%s3082_s26 + $0x20] sm:$0xf]  ;;  %v2504_v2 = vld [vmem:[%s3082_s26 + $0x24] sm:$0xf0]  ;;  %v2155_v3 = vor.u32 %v2552_v63, %v2154_v62  ;;  %v2148_v6 = vld [vmem:[%s3898_s3 + $0x58] sm:$0xf0] }
  0x3a   : > { %629 = vmatpush.bf16.msra.mxu0 %v1979_v28  ;;  %v2568_v4 = vld [vmem:[%s3898_s3 + $0xe4] sm:$0xf0]  ;;  %v2565_v8 = vld [vmem:[%s3898_s3 + $0xd4] sm:$0xf]  ;;  %v2212_v9 = vld [vmem:[%s3898_s3 + $0xd8] sm:$0xf0]  ;;  %v2151_v11 = vor.u32 %v2549_v5, %v2148_v6  ;;  %v1963_v23 = vor.u32 %v2504_v2, %v1962_v1 }
  0x3b   : > { %658 = vmatpush.bf16.msra.mxu1 %v2043_v29  ;;  %687 = vmatpush.bf16.msra.mxu2 %v1983_v30  ;;  %v2219_v7 = vor.u32 %v2568_v4, %v2218_v0  ;;  %v2146_v10 = vld [vmem:[%s3898_s3 + $0x50] sm:$0xf]  ;;  %v2550_v12 = vld [vmem:[%s3898_s3 + $0x54] sm:$0xf0]  ;;  %v2503_v15 = vld [vmem:[%s3082_s26 + $0x24] sm:$0xf]  ;;  %v2215_v17 = vor.u32 %v2565_v8, %v2212_v9 }
  0x3c   : > { %716 = vmatpush.bf16.msra.mxu3 %v2047_v34  ;;  %v2210_v13 = vld [vmem:[%s3898_s3 + $0xd0] sm:$0xf]  ;;  %v2566_v14 = vld [vmem:[%s3898_s3 + $0xd4] sm:$0xf0]  ;;  %v1964_v16 = vld [vmem:[%s3082_s26 + $0x28] sm:$0xf0]  ;;  %v2147_v18 = vor.u32 %v2550_v12, %v2146_v10 }
  0x3d   : > { %630 = vmatmul.bf16.vlgmr.msra.gmra.mxu0 %v1947_v36  ;;  %v2211_v19 = vor.u32 %v2566_v14, %v2210_v13  ;;  %v2547_v20 = vld [vmem:[%s3898_s3 + $0x44] sm:$0xf]  ;;  %v2140_v21 = vld [vmem:[%s3898_s3 + $0x48] sm:$0xf0]  ;;  %v2138_v25 = vld [vmem:[%s3898_s3 + $0x40] sm:$0xf]  ;;  %v1967_v27 = vor.u32 %v2503_v15, %v1964_v16 }
  0x3e   : > { %659 = vmatmul.bf16.vlgmr.msra.gmra.mxu1 %v1951_v37  ;;  %688 = vmatmul.bf16.vlgmr.msra.gmra.mxu2 %v1947_v36  ;;  %v2563_v22 = vld [vmem:[%s3898_s3 + $0xc4] sm:$0xf]  ;;  %v2204_v24 = vld [vmem:[%s3898_s3 + $0xc8] sm:$0xf0]  ;;  %v2548_v26 = vld [vmem:[%s3898_s3 + $0x44] sm:$0xf0]  ;;  %v2143_v30 = vor.u32 %v2547_v20, %v2140_v21 }
  0x3f   : > { %717 = vmatmul.bf16.vlgmr.msra.gmra.mxu3 %v1951_v37  ;;  %1018 = vmatpush.bf16.msrb.mxu2 %v2167_v47  ;;  %v2202_v28 = vld [vmem:[%s3898_s3 + $0xc0] sm:$0xf]  ;;  %v2564_v29 = vld [vmem:[%s3898_s3 + $0xc4] sm:$0xf0]  ;;  %v2207_v31 = vor.u32 %v2563_v22, %v2204_v24  ;;  %v2139_v32 = vor.u32 %v2548_v26, %v2138_v25  ;;  %v2545_v33 = vld [vmem:[%s3898_s3 + $0x34] sm:$0xf] }
  0x40   : > { %1047 = vmatpush.bf16.msrb.mxu3 %v2231_v51  ;;  %960 = vmatpush.bf16.msrb.mxu0 %v2163_v52  ;;  %v2132_v34 = vld [vmem:[%s3898_s3 + $0x38] sm:$0xf0]  ;;  %v2561_v35 = vld [vmem:[%s3898_s3 + $0xb4] sm:$0xf]  ;;  %v2203_v36 = vor.u32 %v2564_v29, %v2202_v28  ;;  %v2130_v38 = vld [vmem:[%s3898_s3 + $0x30] sm:$0xf] }
  0x41   : > { %989 = vmatpush.bf16.msrb.mxu1 %v2227_v56  ;;  %v2196_v37 = vld [vmem:[%s3898_s3 + $0xb8] sm:$0xf0]  ;;  %v2546_v39 = vld [vmem:[%s3898_s3 + $0x34] sm:$0xf0]  ;;  %v2194_v40 = vld [vmem:[%s3898_s3 + $0xb0] sm:$0xf] }
  0x42   : > { %v2562_v41 = vld [vmem:[%s3898_s3 + $0xb4] sm:$0xf0]  ;;  %v2131_v44 = vor.u32 %v2546_v39, %v2130_v38  ;;  %v2543_v45 = vld [vmem:[%s3898_s3 + $0x24] sm:$0xf]  ;;  %v2124_v46 = vld [vmem:[%s3898_s3 + $0x28] sm:$0xf0] }
  0x43   : > { %1019 = vmatpush.bf16.msrb.mxu2 %v2159_v60  ;;  %v2195_v47 = vor.u32 %v2562_v41, %v2194_v40  ;;  %v2559_v48 = vld [vmem:[%s3898_s3 + $0xa4] sm:$0xf]  ;;  %v2188_v49 = vld [vmem:[%s3898_s3 + $0xa8] sm:$0xf0]  ;;  %v2127_v50 = vor.u32 %v2543_v45, %v2124_v46  ;;  %v1970_v52 = vld [vmem:[%s3082_s26 + $0x30] sm:$0xf] }
  0x44   : > { %1048 = vmatpush.bf16.msrb.mxu3 %v2223_v61  ;;  %961 = vmatpush.bf16.msrb.mxu0 %v2155_v3  ;;  %v2191_v51 = vor.u32 %v2559_v48, %v2188_v49  ;;  %v2506_v53 = vld [vmem:[%s3082_s26 + $0x34] sm:$0xf0]  ;;  %v2505_v54 = vld [vmem:[%s3082_s26 + $0x34] sm:$0xf]  ;;  %v1972_v55 = vld [vmem:[%s3082_s26 + $0x38] sm:$0xf0] }
  0x45   : > { %990 = vmatpush.bf16.msrb.mxu1 %v2219_v7  ;;  %v1971_v56 = vor.u32 %v2506_v53, %v1970_v52  ;;  %v1975_v57 = vor.u32 %v2505_v54, %v1972_v55  ;;  %v2122_v58 = vld [vmem:[%s3898_s3 + $0x20] sm:$0xf]  ;;  %v2544_v59 = vld [vmem:[%s3898_s3 + $0x24] sm:$0xf0]  ;;  %v2541_v63 = vld [vmem:[%s3898_s3 + $0x14] sm:$0xf] }
  0x46   : > { %v2186_v60 = vld [vmem:[%s3898_s3 + $0xa0] sm:$0xf]  ;;  %v2123_v61 = vor.u32 %v2544_v59, %v2122_v58  ;;  %v2560_v62 = vld [vmem:[%s3898_s3 + $0xa4] sm:$0xf0]  ;;  %v2116_v0 = vld [vmem:[%s3898_s3 + $0x18] sm:$0xf0] }
  0x47   : > { %1020 = vmatpush.bf16.msrb.mxu2 %v2151_v11  ;;  %v2187_v1 = vor.u32 %v2560_v62, %v2186_v60  ;;  %v2119_v2 = vor.u32 %v2541_v63, %v2116_v0  ;;  %v2114_v3 = vld [vmem:[%s3898_s3 + $0x10] sm:$0xf]  ;;  %v2542_v4 = vld [vmem:[%s3898_s3 + $0x14] sm:$0xf0]  ;;  %v2557_v6 = vld [vmem:[%s3898_s3 + $0x94] sm:$0xf] }
  0x48   : > { %1049 = vmatpush.bf16.msrb.mxu3 %v2215_v17  ;;  %962 = vmatpush.bf16.msrb.mxu0 %v2147_v18  ;;  %v2115_v5 = vor.u32 %v2542_v4, %v2114_v3  ;;  %v2180_v7 = vld [vmem:[%s3898_s3 + $0x98] sm:$0xf0]  ;;  %v2178_v9 = vld [vmem:[%s3898_s3 + $0x90] sm:$0xf]  ;;  %v2558_v10 = vld [vmem:[%s3898_s3 + $0x94] sm:$0xf0] }
  0x49   : > { %991 = vmatpush.bf16.msrb.mxu1 %v2211_v19  ;;  %v2183_v8 = vor.u32 %v2557_v6, %v2180_v7  ;;  %v2539_v11 = vld [vmem:[%s3898_s3 + $0x4] sm:$0xf]  ;;  %v2179_v12 = vor.u32 %v2558_v10, %v2178_v9  ;;  %v2108_v13 = vld [vmem:[%s3898_s3 + $0x8] sm:$0xf0]  ;;  %v2106_v14 = vld [vmem:[%s3898_s3] sm:$0xf] }
  0x4a   : > { %v2540_v15 = vld [vmem:[%s3898_s3 + $0x4] sm:$0xf0]  ;;  %v2111_v16 = vor.u32 %v2539_v11, %v2108_v13  ;;  %v2555_v18 = vld [vmem:[%s3898_s3 + $0x84] sm:$0xf]  ;;  %v2172_v19 = vld [vmem:[%s3898_s3 + $0x88] sm:$0xf0] }
  0x4b   : > { %1021 = vmatpush.bf16.msrb.mxu2 %v2143_v30  ;;  %v2107_v17 = vor.u32 %v2540_v15, %v2106_v14  ;;  %v2170_v20 = vld [vmem:[%s3898_s3 + $0x80] sm:$0xf]  ;;  %v2175_v21 = vor.u32 %v2555_v18, %v2172_v19  ;;  %v2556_v22 = vld [vmem:[%s3898_s3 + $0x84] sm:$0xf0]  ;;  %v2585_v13 = vld [vmem:[%s3882_s5 + $0x74] sm:$0xf] }
  0x4c   : > { %1050 = vmatpush.bf16.msrb.mxu3 %v2207_v31  ;;  %963 = vmatpush.bf16.msrb.mxu0 %v2139_v32  ;;  %v416_v24 = vld [vmem:[%s3899_s2] sm:$0x3]  ;;  %v2292_v14 = vld [vmem:[%s3882_s5 + $0x78] sm:$0xf0]  ;;  %v2601_v15 = vld [vmem:[%s3882_s5 + $0xf4] sm:$0xf] }
  0x4d   : > { %635 = vmatmul.bf16.gmra.mxu0 %v1955_v42  ;;  %992 = vmatpush.bf16.msrb.mxu1 %v2203_v36  ;;  %v3295_v26 = vperm.slane %v416_v24, 0  ;;  %v3298_v30 = vperm.slane %v416_v24, 1  ;;  %v2295_v19 = vor.u32 %v2585_v13, %v2292_v14  ;;  %v2577_v14 = vld [vmem:[%s3882_s5 + $0x34] sm:$0xf]  ;;  %s3521_s26 = scalar_lea.vmem [#allocation2], %s3888_s30  ;;  %s2636_s22 = sshll.u32 %s2859_s17, 7 }
  0x4e   : > { %664 = vmatmul.bf16.gmra.mxu1 %v1959_v43  ;;  %693 = vmatmul.bf16.gmra.mxu2 %v1955_v42  ;;  %v2135_v42 = vor.u32 %v2545_v33, %v2132_v34  ;;  %s1818_s27 = scalar_lea.hbm %s3886_s9, %s2636_s22  ;;  %s1819_s28 = sshll.u32 %s3521_s26, 4  ;;  %s1820_s28 = int_to_ptr.vmem [resolvable:$true] %s1819_s28 }
  0x4f   : > { %722 = vmatmul.bf16.gmra.mxu3 %v1959_v43  ;;  %v2199_v43 = vor.u32 %v2561_v35, %v2196_v37  ;;  %s1821_s11 = sshll.u32 %s1818_s27, 4  ;;  %s1822_s11 = int_to_ptr.hbm [resolvable:$true] %s1821_s11 }
  0x50   : > { %1022 = vmatpush.bf16.msrb.mxu2 %v2135_v42  ;;  %964 = vmatpush.bf16.msrb.mxu0 %v2131_v44  ;;  %s2699_s18 = sshra.s32 %s1822_s11, 4  ;;  %s2700_s18 = int_to_ptr.hbm [resolvable:$true] %s2699_s18 }
  0x51   : > { %1051 = vmatpush.bf16.msrb.mxu3 %v2199_v43  ;;  %993 = vmatpush.bf16.msrb.mxu1 %v2195_v47  ;;  %s2701_s0 = scalar_lea.hbm %s2700_s18, 128  ;;  %p2706_p0 = scmp.lt.s32.totalorder %s2700_s18, %s3886_s9 }
  0x52   : > { %p2702_p11 = scmp.ne.s32.totalorder %s2700_s18, %s2701_s0  ;;  %p2707_p1 = scmp.lt.s32.totalorder %s2705_s1, %s2701_s0 }
  0x54   : > { %1023 = vmatpush.bf16.msrb.mxu2 %v2127_v50  ;;  %965 = vmatpush.bf16.msrb.mxu0 %v2123_v61  ;;  %p2703_p12 = pnand %p2702_p11, %p2876_p5  ;;  %p2708_p2 = por %p2707_p1, %p2706_p0 }
  0x55   : > { %1052 = vmatpush.bf16.msrb.mxu3 %v2191_v51  ;;  %994 = vmatpush.bf16.msrb.mxu1 %v2187_v1 }
  0x56   : > { %p2704_p13 = pneg %p2703_p12 }
  0x58   : > { %1024 = vmatpush.bf16.msrb.mxu2 %v2119_v2  ;;  %966 = vmatpush.bf16.msrb.mxu0 %v2115_v5  ;;  %p2709_p3 = pnand %p2708_p2, %p2704_p13 }
  0x59   : > { %1053 = vmatpush.bf16.msrb.mxu3 %v2183_v8  ;;  %995 = vmatpush.bf16.msrb.mxu1 %v2179_v12 }
  0x5c   : > { %1025 = vmatpush.bf16.msrb.mxu2 %v2111_v16  ;;  %967 = vmatpush.bf16.msrb.mxu0 %v2107_v17 }
  0x5d   : > { %640 = vmatmul.bf16.gmra.mxu0 %v1963_v23  ;;  %1054 = vmatpush.bf16.msrb.mxu3 %v2175_v21  ;;  %v2290_v21 = vld [vmem:[%s3882_s5 + $0x70] sm:$0xf] }
  0x5e   : > { %669 = vmatmul.bf16.gmra.mxu1 %v1967_v27  ;;  %698 = vmatmul.bf16.gmra.mxu2 %v1963_v23  ;;  %v2171_v23 = vor.u32 %v2556_v22, %v2170_v20  ;;  %v2356_v20 = vld [vmem:[%s3882_s5 + $0xf8] sm:$0xf0]  ;;  %v2586_v22 = vld [vmem:[%s3882_s5 + $0x74] sm:$0xf0] }
  0x5f   : > { %727 = vmatmul.bf16.gmra.mxu3 %v1967_v27  ;;  %v2291_v24 = vor.u32 %v2586_v22, %v2290_v21  ;;  %v2324_v21 = vld [vmem:[%s3882_s5 + $0xb8] sm:$0xf0]  ;;  %v2258_v22 = vld [vmem:[%s3882_s5 + $0x30] sm:$0xf] }
  0x60   : > { %996 = vmatpush.bf16.msrb.mxu1 %v2171_v23  ;;  %v2359_v23 = vor.u32 %v2601_v15, %v2356_v20  ;;  %1372 = vmatpush.bf16.msra.mxu2 %v2295_v19  ;;  %v2260_v15 = vld [vmem:[%s3882_s5 + $0x38] sm:$0xf0] }
  0x61   : > { %1314 = vmatpush.bf16.msra.mxu0 %v2291_v24 }
  0x62   : > { %1401 = vmatpush.bf16.msra.mxu3 %v2359_v23  ;;  %v2578_v23 = vld [vmem:[%s3882_s5 + $0x34] sm:$0xf0] }
  0x6d   : > { %645 = vmatmul.bf16.gmra.mxu0 %v1971_v56 }
  0x6e   : > { %674 = vmatmul.bf16.gmra.mxu1 %v1975_v57  ;;  %703 = vmatmul.bf16.gmra.mxu2 %v1971_v56 }
  0x6f   : > { %732 = vmatmul.bf16.gmra.mxu3 %v1975_v57 }
  0xba   : > { %v631_v25 = vpop.f32.mrf.mxu0 }
  0xbb   : > { %v660_v27 = vpop.f32.mrf.mxu1  ;;  %v632_v28 = vadd.f32 %v631_v25, %v3295_v26  ;;  %v2354_v25 = vld [vmem:[%s3882_s5 + $0xf0] sm:$0xf] }
  0xbd   : > { %v661_v33 = vadd.f32 %v660_v27, %v632_v28  ;;  %v2602_v27 = vld [vmem:[%s3882_s5 + $0xf4] sm:$0xf0]  ;;  %v2583_v28 = vld [vmem:[%s3882_s5 + $0x64] sm:$0xf] }
  0xbf   : > { %v738_v38 = vmax.f32 %v661_v33, 0.0  ;;  %v2284_v33 = vld [vmem:[%s3882_s5 + $0x68] sm:$0xf0] }
  0xc1   : > { %v689_v29 = vpop.f32.mrf.mxu2 }
  0xc2   : > { %v718_v31 = vpop.f32.mrf.mxu3  ;;  %v633_v32 = vpop.f32.mrf.mxu0  ;;  %v690_v37 = vadd.f32 %v689_v29, %v3298_v30 }
  0xc3   : > { %v634_v34 = vadd.f32 %v633_v32, %v3295_v26  ;;  %v662_v35 = vpop.f32.mrf.mxu1  ;;  %v2355_v32 = vor.u32 %v2602_v27, %v2354_v25  ;;  %v2263_v25 = vor.u32 %v2577_v14, %v2260_v15  ;;  %v2322_v27 = vld [vmem:[%s3882_s5 + $0xb0] sm:$0xf]  ;;  %v2587_v15 = vld [vmem:[%s3882_s5 + $0x84] sm:$0xf] }
  0xc4   : > { %v719_v42 = vadd.f32 %v718_v31, %v690_v37 }
  0xc5   : > { %v663_v36 = vadd.f32 %v662_v35, %v634_v34  ;;  %v2599_v34 = vld [vmem:[%s3882_s5 + $0xe4] sm:$0xf]  ;;  %v2348_v35 = vld [vmem:[%s3882_s5 + $0xe8] sm:$0xf0]  ;;  %1343 = vmatpush.bf16.msra.mxu1 %v2355_v32 }
  0xc6   : > { %v739_v48 = vmax.f32 %v719_v42, 0.0  ;;  %v2351_v37 = vor.u32 %v2599_v34, %v2348_v35  ;;  %v2259_v35 = vor.u32 %v2578_v23, %v2258_v22 }
  0xc7   : > { %v740_v39 = vmax.f32 %v663_v36, 0.0  ;;  %v2287_v36 = vor.u32 %v2583_v28, %v2284_v33  ;;  %v2594_v28 = vld [vmem:[%s3882_s5 + $0xb4] sm:$0xf0] }
  0xc8   : > { %1402 = vmatpush.bf16.msra.mxu3 %v2351_v37  ;;  %v2323_v37 = vor.u32 %v2594_v28, %v2322_v27 }
  0xc9   : > { %v691_v40 = vpop.f32.mrf.mxu2  ;;  %v754_v41 = vpack.c.bf16 %v740_v39, %v738_v38  ;;  %v2282_v38 = vld [vmem:[%s3882_s5 + $0x60] sm:$0xf]  ;;  %v2584_v39 = vld [vmem:[%s3882_s5 + $0x64] sm:$0xf0]  ;;  %1373 = vmatpush.bf16.msra.mxu2 %v2287_v36 }
  0xca   : > { %v692_v43 = vadd.f32 %v691_v40, %v3298_v30  ;;  %v720_v44 = vpop.f32.mrf.mxu3  ;;  %v636_v45 = vpop.f32.mrf.mxu0  ;;  %v2283_v42 = vor.u32 %v2584_v39, %v2282_v38 }
  0xcb   : > { %v665_v46 = vpop.f32.mrf.mxu1  ;;  %968 = vmatmul.bf16.vlgmr.msrb.gmra.mxu0 %v754_v41  ;;  %1026 = vmatmul.bf16.vlgmr.msrb.gmra.mxu2 %v754_v41  ;;  %v637_v50 = vadd.f32 %v636_v45, %v3295_v26 }
  0xcc   : > { %v721_v47 = vadd.f32 %v720_v44, %v692_v43  ;;  %v2346_v43 = vld [vmem:[%s3882_s5 + $0xe0] sm:$0xf]  ;;  %v2600_v44 = vld [vmem:[%s3882_s5 + $0xe4] sm:$0xf0]  ;;  %1315 = vmatpush.bf16.msra.mxu0 %v2283_v42 }
  0xcd   : > { %v666_v55 = vadd.f32 %v665_v46, %v637_v50  ;;  %v2347_v45 = vor.u32 %v2600_v44, %v2346_v43  ;;  %v2581_v46 = vld [vmem:[%s3882_s5 + $0x54] sm:$0xf] }
  0xce   : > { %v741_v49 = vmax.f32 %v721_v47, 0.0  ;;  %v2276_v47 = vld [vmem:[%s3882_s5 + $0x58] sm:$0xf0] }
  0xcf   : > { %v742_v60 = vmax.f32 %v666_v55, 0.0  ;;  %v2582_v55 = vld [vmem:[%s3882_s5 + $0x54] sm:$0xf0]  ;;  %1344 = vmatpush.bf16.msra.mxu1 %v2347_v45 }
  0xd0   : > { %v755_v51 = vpack.c.bf16 %v741_v49, %v739_v48  ;;  %v2597_v48 = vld [vmem:[%s3882_s5 + $0xd4] sm:$0xf] }
  0xd1   : > { %v694_v52 = vpop.f32.mrf.mxu2 }
  0xd2   : > { %v723_v53 = vpop.f32.mrf.mxu3  ;;  %997 = vmatmul.bf16.vlgmr.msrb.gmra.mxu1 %v755_v51  ;;  %1055 = vmatmul.bf16.vlgmr.msrb.gmra.mxu3 %v755_v51  ;;  %v638_v54 = vpop.f32.mrf.mxu0  ;;  %v695_v59 = vadd.f32 %v694_v52, %v3298_v30  ;;  %v2279_v52 = vor.u32 %v2581_v46, %v2276_v47 }
  0xd3   : > { %v639_v56 = vadd.f32 %v638_v54, %v3295_v26  ;;  %v667_v57 = vpop.f32.mrf.mxu1  ;;  %v2274_v54 = vld [vmem:[%s3882_s5 + $0x50] sm:$0xf] }
  0xd4   : > { %v724_v0 = vadd.f32 %v723_v53, %v695_v59  ;;  %v2340_v53 = vld [vmem:[%s3882_s5 + $0xd8] sm:$0xf0]  ;;  %1374 = vmatpush.bf16.msra.mxu2 %v2279_v52 }
  0xd5   : > { %v668_v58 = vadd.f32 %v667_v57, %v639_v56  ;;  %v2343_v59 = vor.u32 %v2597_v48, %v2340_v53  ;;  %v2316_v53 = vld [vmem:[%s3882_s5 + $0xa8] sm:$0xf0] }
  0xd6   : > { %v743_v6 = vmax.f32 %v724_v0, 0.0 }
  0xd7   : > { %v744_v61 = vmax.f32 %v668_v58, 0.0  ;;  %1403 = vmatpush.bf16.msra.mxu3 %v2343_v59  ;;  %v2592_v59 = vld [vmem:[%s3882_s5 + $0xa4] sm:$0xf0] }
  0xd9   : > { %v696_v62 = vpop.f32.mrf.mxu2  ;;  %v756_v63 = vpack.c.bf16 %v744_v61, %v742_v60  ;;  %v2275_v60 = vor.u32 %v2582_v55, %v2274_v54  ;;  %v2338_v61 = vld [vmem:[%s3882_s5 + $0xd0] sm:$0xf]  ;;  %v2250_v54 = vld [vmem:[%s3882_s5 + $0x20] sm:$0xf]  ;;  %v2576_v55 = vld [vmem:[%s3882_s5 + $0x24] sm:$0xf0] }
  0xda   : > { %v697_v1 = vadd.f32 %v696_v62, %v3298_v30  ;;  %v725_v2 = vpop.f32.mrf.mxu3  ;;  %v641_v3 = vpop.f32.mrf.mxu0  ;;  %v2598_v62 = vld [vmem:[%s3882_s5 + $0xd4] sm:$0xf0] }
  0xdb   : > { %v670_v4 = vpop.f32.mrf.mxu1  ;;  %973 = vmatmul.bf16.gmra.mxu0 %v756_v63  ;;  %1031 = vmatmul.bf16.gmra.mxu2 %v756_v63  ;;  %v642_v8 = vadd.f32 %v641_v3, %v3295_v26  ;;  %v2579_v63 = vld [vmem:[%s3882_s5 + $0x44] sm:$0xf] }
  0xdc   : > { %v726_v5 = vadd.f32 %v725_v2, %v697_v1  ;;  %v2268_v1 = vld [vmem:[%s3882_s5 + $0x48] sm:$0xf0]  ;;  %v2595_v2 = vld [vmem:[%s3882_s5 + $0xc4] sm:$0xf]  ;;  %1316 = vmatpush.bf16.msra.mxu0 %v2275_v60  ;;  %v2573_v60 = vld [vmem:[%s3882_s5 + $0x14] sm:$0xf] }
  0xdd   : > { %v671_v16 = vadd.f32 %v670_v4, %v642_v8  ;;  %v2339_v4 = vor.u32 %v2598_v62, %v2338_v61  ;;  %v2271_v8 = vor.u32 %v2579_v63, %v2268_v1  ;;  %v2244_v62 = vld [vmem:[%s3882_s5 + $0x18] sm:$0xf0]  ;;  %v2589_v63 = vld [vmem:[%s3882_s5 + $0x94] sm:$0xf] }
  0xde   : > { %v745_v7 = vmax.f32 %v726_v5, 0.0  ;;  %v2332_v5 = vld [vmem:[%s3882_s5 + $0xc8] sm:$0xf0]  ;;  %v2247_v1 = vor.u32 %v2573_v60, %v2244_v62 }
  0xdf   : > { %v746_v40 = vmax.f32 %v671_v16, 0.0  ;;  %v2335_v16 = vor.u32 %v2595_v2, %v2332_v5  ;;  %1345 = vmatpush.bf16.msra.mxu1 %v2339_v4  ;;  %1375 = vmatpush.bf16.msra.mxu2 %v2271_v8  ;;  %v2574_v4 = vld [vmem:[%s3882_s5 + $0x14] sm:$0xf0]  ;;  %v2234_v8 = vld [vmem:[%s3882_s5] sm:$0xf] }
  0xe0   : > { %v757_v9 = vpack.c.bf16 %v745_v7, %v743_v6  ;;  %v2266_v6 = vld [vmem:[%s3882_s5 + $0x40] sm:$0xf]  ;;  %v2580_v7 = vld [vmem:[%s3882_s5 + $0x44] sm:$0xf0] }
  0xe1   : > { %v699_v10 = vpop.f32.mrf.mxu2  ;;  %1404 = vmatpush.bf16.msra.mxu3 %v2335_v16  ;;  %v2300_v16 = vld [vmem:[%s3882_s5 + $0x88] sm:$0xf0] }
  0xe2   : > { %v728_v11 = vpop.f32.mrf.mxu3  ;;  %1002 = vmatmul.bf16.gmra.mxu1 %v757_v9  ;;  %1060 = vmatmul.bf16.gmra.mxu3 %v757_v9  ;;  %v643_v12 = vpop.f32.mrf.mxu0  ;;  %v700_v29 = vadd.f32 %v699_v10, %v3298_v30  ;;  %v2330_v9 = vld [vmem:[%s3882_s5 + $0xc0] sm:$0xf]  ;;  %v2596_v10 = vld [vmem:[%s3882_s5 + $0xc4] sm:$0xf0] }
  0xe3   : > { %v644_v17 = vadd.f32 %v643_v12, %v3295_v26  ;;  %v672_v18 = vpop.f32.mrf.mxu1  ;;  %v2331_v20 = vor.u32 %v2596_v10, %v2330_v9  ;;  %1376 = vmatpush.bf16.msra.mxu2 %v2263_v25  ;;  %v2572_v10 = vld [vmem:[%s3882_s5 + $0x4] sm:$0xf0] }
  0xe4   : > { %v729_v49 = vadd.f32 %v728_v11, %v700_v29 }
  0xe5   : > { %v673_v31 = vadd.f32 %v672_v18, %v644_v17  ;;  %v2267_v17 = vor.u32 %v2580_v7, %v2266_v6  ;;  %v2593_v18 = vld [vmem:[%s3882_s5 + $0xb4] sm:$0xf]  ;;  %1346 = vmatpush.bf16.msra.mxu1 %v2331_v20  ;;  %v2571_v6 = vld [vmem:[%s3882_s5 + $0x4] sm:$0xf]  ;;  %v2236_v7 = vld [vmem:[%s3882_s5 + $0x8] sm:$0xf0] }
  0xe6   : > { %v747_v11 = vmax.f32 %v729_v49, 0.0  ;;  %v2327_v34 = vor.u32 %v2593_v18, %v2324_v21  ;;  %v2239_v9 = vor.u32 %v2571_v6, %v2236_v7  ;;  %v2298_v18 = vld [vmem:[%s3882_s5 + $0x80] sm:$0xf] }
  0xe7   : > { %v748_v41 = vmax.f32 %v673_v31, 0.0  ;;  %1317 = vmatpush.bf16.msra.mxu0 %v2267_v17  ;;  %v2303_v17 = vor.u32 %v2587_v15, %v2300_v16  ;;  %v794_v21 = vld [vmem:[%s3881_s4] sm:$0x3]  ;;  %v2633_v16 = vld [vmem:[%s3884_s7 + $0xf4] sm:$0xf] }
  0xe8   : > { %1405 = vmatpush.bf16.msra.mxu3 %v2327_v34  ;;  %v3510_v23 = vperm.slane %v794_v21, 0 }
  0xe9   : > { %v701_v50 = vpop.f32.mrf.mxu2  ;;  %v758_v51 = vpack.c.bf16 %v748_v41, %v746_v40  ;;  %1347 = vmatpush.bf16.msra.mxu1 %v2323_v37 }
  0xea   : > { %v702_v56 = vadd.f32 %v701_v50, %v3298_v30  ;;  %v730_v57 = vpop.f32.mrf.mxu3  ;;  %v646_v58 = vpop.f32.mrf.mxu0  ;;  %v2575_v50 = vld [vmem:[%s3882_s5 + $0x24] sm:$0xf] }
  0xeb   : > { %v675_v0 = vpop.f32.mrf.mxu1  ;;  %978 = vmatmul.bf16.gmra.mxu0 %v758_v51  ;;  %1036 = vmatmul.bf16.gmra.mxu2 %v758_v51  ;;  %v647_v13 = vadd.f32 %v646_v58, %v3295_v26  ;;  %v2252_v51 = vld [vmem:[%s3882_s5 + $0x28] sm:$0xf0]  ;;  %v2314_v58 = vld [vmem:[%s3882_s5 + $0xa0] sm:$0xf] }
  0xec   : > { %v731_v3 = vadd.f32 %v730_v57, %v702_v56  ;;  %1318 = vmatpush.bf16.msra.mxu0 %v2259_v35  ;;  %v2255_v52 = vor.u32 %v2575_v50, %v2252_v51  ;;  %v2251_v57 = vor.u32 %v2576_v55, %v2250_v54  ;;  %v2315_v61 = vor.u32 %v2592_v59, %v2314_v58 }
  0xed   : > { %v676_v29 = vadd.f32 %v675_v0, %v647_v13  ;;  %v2308_v0 = vld [vmem:[%s3882_s5 + $0x98] sm:$0xf0]  ;;  %v2235_v13 = vor.u32 %v2572_v10, %v2234_v8 }
  0xee   : > { %v749_v12 = vmax.f32 %v731_v3, 0.0  ;;  %1377 = vmatpush.bf16.msra.mxu2 %v2255_v52  ;;  %v2311_v2 = vor.u32 %v2589_v63, %v2308_v0  ;;  %v2242_v3 = vld [vmem:[%s3882_s5 + $0x10] sm:$0xf]  ;;  %1348 = vmatpush.bf16.msra.mxu1 %v2315_v61 }
  0xef   : > { %v750_v40 = vmax.f32 %v676_v29, 0.0  ;;  %v2243_v5 = vor.u32 %v2574_v4, %v2242_v3  ;;  %v3517_v29 = vperm.slane %v794_v21, 1 }
  0xf0   : > { %v759_v19 = vpack.c.bf16 %v749_v12, %v747_v11  ;;  %1319 = vmatpush.bf16.msra.mxu0 %v2251_v57  ;;  %v2306_v11 = vld [vmem:[%s3882_s5 + $0x90] sm:$0xf]  ;;  %v2590_v12 = vld [vmem:[%s3882_s5 + $0x94] sm:$0xf0] }
  0xf1   : > { %v704_v24 = vpop.f32.mrf.mxu2  ;;  %v2307_v14 = vor.u32 %v2590_v12, %v2306_v11  ;;  %v2617_v12 = vld [vmem:[%s3884_s7 + $0x74] sm:$0xf] }
  0xf2   : > { %v733_v31 = vpop.f32.mrf.mxu3  ;;  %1007 = vmatmul.bf16.gmra.mxu1 %v759_v19  ;;  %1065 = vmatmul.bf16.gmra.mxu3 %v759_v19  ;;  %v648_v32 = vpop.f32.mrf.mxu0  ;;  %v705_v39 = vadd.f32 %v704_v24, %v3298_v30  ;;  %v2588_v19 = vld [vmem:[%s3882_s5 + $0x84] sm:$0xf0] }
  0xf3   : > { %v649_v33 = vadd.f32 %v648_v32, %v3295_v26  ;;  %v677_v36 = vpop.f32.mrf.mxu1  ;;  %1378 = vmatpush.bf16.msra.mxu2 %v2247_v1  ;;  %1349 = vmatpush.bf16.msra.mxu1 %v2307_v14  ;;  %v2299_v20 = vor.u32 %v2588_v19, %v2298_v18  ;;  %v2418_v18 = vld [vmem:[%s3884_s7 + $0x70] sm:$0xf] }
  0xf4   : > { %v734_v44 = vadd.f32 %v733_v31, %v705_v39  ;;  %1320 = vmatpush.bf16.msra.mxu0 %v2243_v5 }
  0xf5   : > { %v678_v38 = vadd.f32 %v677_v36, %v649_v33 }
  0xf6   : > { %v751_v47 = vmax.f32 %v734_v44, 0.0 }
  0xf7   : > { %v752_v41 = vmax.f32 %v678_v38, 0.0  ;;  %1379 = vmatpush.bf16.msra.mxu2 %v2239_v9  ;;  %1350 = vmatpush.bf16.msra.mxu1 %v2299_v20 }
  0xf8   : > { %1321 = vmatpush.bf16.msra.mxu0 %v2235_v13  ;;  %v2420_v13 = vld [vmem:[%s3884_s7 + $0x78] sm:$0xf0] }
  0xf9   : > { %v706_v42 = vpop.f32.mrf.mxu2  ;;  %v760_v43 = vpack.c.bf16 %v752_v41, %v750_v40  ;;  %v2423_v15 = vor.u32 %v2617_v12, %v2420_v13  ;;  %v2609_v13 = vld [vmem:[%s3884_s7 + $0x34] sm:$0xf] }
  0xfa   : > { %v707_v26 = vadd.f32 %v706_v42, %v3298_v30  ;;  %v735_v45 = vpop.f32.mrf.mxu3  ;;  %v2591_v30 = vld [vmem:[%s3882_s5 + $0xa4] sm:$0xf] }
  0xfb   : > { %983 = vmatmul.bf16.gmra.mxu0 %v760_v43  ;;  %1041 = vmatmul.bf16.gmra.mxu2 %v760_v43  ;;  %v2319_v56 = vor.u32 %v2591_v30, %v2316_v53 }
  0xfc   : > { %v736_v46 = vadd.f32 %v735_v45, %v707_v26  ;;  %1710 = vmatpush.bf16.msrb.mxu2 %v2423_v15 }
  0xfd   : > { %1406 = vmatpush.bf16.msra.mxu3 %v2319_v56 }
  0xfe   : > { %v753_v48 = vmax.f32 %v736_v46, 0.0 }
 0x100   : > { %v761_v49 = vpack.c.bf16 %v753_v48, %v751_v47 }
 0x101   : > { %1407 = vmatpush.bf16.msra.mxu3 %v2311_v2 }
 0x102   : > { %1012 = vmatmul.bf16.gmra.mxu1 %v761_v49  ;;  %1070 = vmatmul.bf16.gmra.mxu3 %v761_v49 }
 0x105   : > { %1408 = vmatpush.bf16.msra.mxu3 %v2303_v17  ;;  %v2484_v17 = vld [vmem:[%s3884_s7 + $0xf8] sm:$0xf0] }
 0x148   : > { %v969_v22 = vpop.f32.mrf.mxu0 }
 0x149   : > { %v970_v24 = vadd.f32 %v969_v22, %v3510_v23  ;;  %v2487_v22 = vor.u32 %v2633_v16, %v2484_v17  ;;  %v2625_v17 = vld [vmem:[%s3884_s7 + $0xb4] sm:$0xf] }
 0x14b   : > { %1739 = vmatpush.bf16.msrb.mxu3 %v2487_v22 }
 0x14e   : > { %v1027_v25 = vpop.f32.mrf.mxu2 }
 0x14f   : > { %v998_v27 = vpop.f32.mrf.mxu1  ;;  %v1028_v33 = vadd.f32 %v1027_v25, %v3517_v29  ;;  %v2482_v25 = vld [vmem:[%s3884_s7 + $0xf0] sm:$0xf] }
 0x150   : > { %v999_v28 = vadd.f32 %v998_v27, %v970_v24  ;;  %v971_v31 = vpop.f32.mrf.mxu0  ;;  %v2618_v24 = vld [vmem:[%s3884_s7 + $0x74] sm:$0xf0] }
 0x151   : > { %v972_v35 = vadd.f32 %v971_v31, %v3510_v23  ;;  %v2634_v27 = vld [vmem:[%s3884_s7 + $0xf4] sm:$0xf0]  ;;  %v2419_v31 = vor.u32 %v2618_v24, %v2418_v18  ;;  %v2452_v18 = vld [vmem:[%s3884_s7 + $0xb8] sm:$0xf0]  ;;  %v2386_v24 = vld [vmem:[%s3884_s7 + $0x30] sm:$0xf] }
 0x152   : > { %v1076_v32 = vmax.f32 %v999_v28, 0.0 }
 0x153   : > { %1652 = vmatpush.bf16.msrb.mxu0 %v2419_v31 }
 0x154   : > { %1092 = vst [vmem:[%s3521_s26] sm:$0xff] %v1076_v32 }
 0x155   : > { %v1056_v34 = vpop.f32.mrf.mxu3 }
 0x156   : > { %v1057_v36 = vadd.f32 %v1056_v34, %v1028_v33  ;;  %v1029_v37 = vpop.f32.mrf.mxu2  ;;  %v2615_v33 = vld [vmem:[%s3884_s7 + $0x64] sm:$0xf]  ;;  %v2412_v34 = vld [vmem:[%s3884_s7 + $0x68] sm:$0xf0] }
 0x157   : > { %v1000_v38 = vpop.f32.mrf.mxu1  ;;  %v1030_v44 = vadd.f32 %v1029_v37, %v3517_v29 }
 0x158   : > { %v1077_v39 = vmax.f32 %v1057_v36, 0.0  ;;  %v1001_v40 = vadd.f32 %v1000_v38, %v972_v35  ;;  %v974_v41 = vpop.f32.mrf.mxu0  ;;  %v2631_v35 = vld [vmem:[%s3884_s7 + $0xe4] sm:$0xf]  ;;  %v2415_v38 = vor.u32 %v2615_v33, %v2412_v34 }
 0x159   : > { %v975_v45 = vadd.f32 %v974_v41, %v3510_v23 }
 0x15a   : > { %1093 = vst [vmem:[%s3521_s26 + $0x8] sm:$0xff] %v1077_v39  ;;  %v1078_v42 = vmax.f32 %v1001_v40, 0.0  ;;  %v2410_v40 = vld [vmem:[%s3884_s7 + $0x60] sm:$0xf]  ;;  %1711 = vmatpush.bf16.msrb.mxu2 %v2415_v38 }
 0x15c   : > { %1094 = vst [vmem:[%s3521_s26 + $0x10] sm:$0xff] %v1078_v42  ;;  %v1108_v43 = vpack.c.bf16 %v1078_v42, %v1076_v32  ;;  %v2483_v32 = vor.u32 %v2634_v27, %v2482_v25  ;;  %v2610_v25 = vld [vmem:[%s3884_s7 + $0x34] sm:$0xf0] }
 0x15d   : > { %v1058_v26 = vpop.f32.mrf.mxu3  ;;  %v2387_v33 = vor.u32 %v2610_v25, %v2386_v24 }
 0x15e   : > { %v1059_v46 = vadd.f32 %v1058_v26, %v1030_v44  ;;  %1322 = vmatmul.bf16.vlgmr.msra.gmra.mxu0 %v1108_v43  ;;  %1380 = vmatmul.bf16.vlgmr.msra.gmra.mxu2 %v1108_v43  ;;  %v1032_v47 = vpop.f32.mrf.mxu2  ;;  %v2616_v43 = vld [vmem:[%s3884_s7 + $0x64] sm:$0xf0]  ;;  %v2474_v44 = vld [vmem:[%s3884_s7 + $0xe0] sm:$0xf] }
 0x15f   : > { %v1003_v48 = vpop.f32.mrf.mxu1  ;;  %v1033_v53 = vadd.f32 %v1032_v47, %v3517_v29  ;;  %1681 = vmatpush.bf16.msrb.mxu1 %v2483_v32  ;;  %v2632_v26 = vld [vmem:[%s3884_s7 + $0xe4] sm:$0xf0]  ;;  %v2455_v32 = vor.u32 %v2625_v17, %v2452_v18 }
 0x160   : > { %v1079_v49 = vmax.f32 %v1059_v46, 0.0  ;;  %v1004_v50 = vadd.f32 %v1003_v48, %v975_v45  ;;  %v976_v51 = vpop.f32.mrf.mxu0  ;;  %v2411_v46 = vor.u32 %v2616_v43, %v2410_v40  ;;  %v2475_v47 = vor.u32 %v2632_v26, %v2474_v44  ;;  %v2613_v48 = vld [vmem:[%s3884_s7 + $0x54] sm:$0xf] }
 0x161   : > { %v977_v55 = vadd.f32 %v976_v51, %v3510_v23  ;;  %v2629_v51 = vld [vmem:[%s3884_s7 + $0xd4] sm:$0xf] }
 0x162   : > { %1095 = vst [vmem:[%s3521_s26 + $0x18] sm:$0xff] %v1079_v49  ;;  %v1109_v30 = vpack.c.bf16 %v1079_v49, %v1077_v39  ;;  %v1080_v52 = vmax.f32 %v1004_v50, 0.0  ;;  %v2476_v39 = vld [vmem:[%s3884_s7 + $0xe8] sm:$0xf0]  ;;  %v2404_v49 = vld [vmem:[%s3884_s7 + $0x58] sm:$0xf0]  ;;  %1653 = vmatpush.bf16.msrb.mxu0 %v2411_v46 }
 0x163   : > { %v2479_v42 = vor.u32 %v2631_v35, %v2476_v39  ;;  %v2407_v50 = vor.u32 %v2613_v48, %v2404_v49  ;;  %1682 = vmatpush.bf16.msrb.mxu1 %v2475_v47  ;;  %v2626_v46 = vld [vmem:[%s3884_s7 + $0xb4] sm:$0xf0]  ;;  %v2380_v48 = vld [vmem:[%s3884_s7 + $0x28] sm:$0xf0]  ;;  %v2623_v49 = vld [vmem:[%s3884_s7 + $0xa4] sm:$0xf] }
 0x164   : > { %1096 = vst [vmem:[%s3521_s26 + $0x20] sm:$0xff] %v1080_v52  ;;  %1351 = vmatmul.bf16.vlgmr.msra.gmra.mxu1 %v1109_v30  ;;  %1409 = vmatmul.bf16.vlgmr.msra.gmra.mxu3 %v1109_v30  ;;  %v2468_v30 = vld [vmem:[%s3884_s7 + $0xd8] sm:$0xf0] }
 0x165   : > { %v1061_v54 = vpop.f32.mrf.mxu3  ;;  %1740 = vmatpush.bf16.msrb.mxu3 %v2479_v42  ;;  %1712 = vmatpush.bf16.msrb.mxu2 %v2407_v50  ;;  %v2444_v50 = vld [vmem:[%s3884_s7 + $0xa8] sm:$0xf0] }
 0x166   : > { %v1062_v56 = vadd.f32 %v1061_v54, %v1033_v53  ;;  %v1034_v57 = vpop.f32.mrf.mxu2 }
 0x167   : > { %v1005_v58 = vpop.f32.mrf.mxu1  ;;  %v1035_v63 = vadd.f32 %v1034_v57, %v3517_v29  ;;  %v2466_v57 = vld [vmem:[%s3884_s7 + $0xd0] sm:$0xf] }
 0x168   : > { %v1081_v59 = vmax.f32 %v1062_v56, 0.0  ;;  %v1006_v60 = vadd.f32 %v1005_v58, %v977_v55  ;;  %v979_v61 = vpop.f32.mrf.mxu0  ;;  %v2471_v55 = vor.u32 %v2629_v51, %v2468_v30  ;;  %v2614_v56 = vld [vmem:[%s3884_s7 + $0x54] sm:$0xf0]  ;;  %v2447_v30 = vor.u32 %v2623_v49, %v2444_v50 }
 0x169   : > { %v980_v2 = vadd.f32 %v979_v61, %v3510_v23  ;;  %v2611_v61 = vld [vmem:[%s3884_s7 + $0x44] sm:$0xf] }
 0x16a   : > { %1097 = vst [vmem:[%s3521_s26 + $0x28] sm:$0xff] %v1081_v59  ;;  %v1082_v62 = vmax.f32 %v1006_v60, 0.0  ;;  %v2630_v60 = vld [vmem:[%s3884_s7 + $0xd4] sm:$0xf0]  ;;  %1741 = vmatpush.bf16.msrb.mxu3 %v2471_v55  ;;  %v2442_v55 = vld [vmem:[%s3884_s7 + $0xa0] sm:$0xf] }
 0x16c   : > { %1098 = vst [vmem:[%s3521_s26 + $0x30] sm:$0xff] %v1082_v62  ;;  %v1110_v0 = vpack.c.bf16 %v1082_v62, %v1080_v52  ;;  %v2402_v52 = vld [vmem:[%s3884_s7 + $0x50] sm:$0xf]  ;;  %v2396_v62 = vld [vmem:[%s3884_s7 + $0x48] sm:$0xf0] }
 0x16d   : > { %v1063_v1 = vpop.f32.mrf.mxu3 }
 0x16e   : > { %v1064_v3 = vadd.f32 %v1063_v1, %v1035_v63  ;;  %1327 = vmatmul.bf16.gmra.mxu0 %v1110_v0  ;;  %1385 = vmatmul.bf16.gmra.mxu2 %v1110_v0  ;;  %v1037_v4 = vpop.f32.mrf.mxu2  ;;  %v2467_v1 = vor.u32 %v2630_v60, %v2466_v57  ;;  %v2605_v57 = vld [vmem:[%s3884_s7 + $0x14] sm:$0xf] }
 0x16f   : > { %v1008_v5 = vpop.f32.mrf.mxu1  ;;  %v1038_v11 = vadd.f32 %v1037_v4, %v3517_v29  ;;  %v2394_v4 = vld [vmem:[%s3884_s7 + $0x40] sm:$0xf]  ;;  %v2621_v60 = vld [vmem:[%s3884_s7 + $0x94] sm:$0xf] }
 0x170   : > { %v1083_v6 = vmax.f32 %v1064_v3, 0.0  ;;  %v1009_v7 = vadd.f32 %v1008_v5, %v980_v2  ;;  %v981_v8 = vpop.f32.mrf.mxu0  ;;  %v2627_v2 = vld [vmem:[%s3884_s7 + $0xc4] sm:$0xf]  ;;  %v2460_v3 = vld [vmem:[%s3884_s7 + $0xc8] sm:$0xf0]  ;;  %1683 = vmatpush.bf16.msrb.mxu1 %v2467_v1 }
 0x171   : > { %v982_v19 = vadd.f32 %v981_v8, %v3510_v23  ;;  %v2612_v8 = vld [vmem:[%s3884_s7 + $0x44] sm:$0xf0]  ;;  %v2463_v15 = vor.u32 %v2627_v2, %v2460_v3  ;;  %v2606_v1 = vld [vmem:[%s3884_s7 + $0x14] sm:$0xf0]  ;;  %v2603_v3 = vld [vmem:[%s3884_s7 + $0x4] sm:$0xf] }
 0x172   : > { %1099 = vst [vmem:[%s3521_s26 + $0x38] sm:$0xff] %v1083_v6  ;;  %v1084_v9 = vmax.f32 %v1009_v7, 0.0  ;;  %v1111_v10 = vpack.c.bf16 %v1083_v6, %v1081_v59  ;;  %v2403_v59 = vor.u32 %v2614_v56, %v2402_v52  ;;  %v2399_v7 = vor.u32 %v2611_v61, %v2396_v62  ;;  %v2378_v52 = vld [vmem:[%s3884_s7 + $0x20] sm:$0xf]  ;;  %v2624_v56 = vld [vmem:[%s3884_s7 + $0xa4] sm:$0xf0] }
 0x173   : > { %v2395_v16 = vor.u32 %v2612_v8, %v2394_v4  ;;  %1742 = vmatpush.bf16.msrb.mxu3 %v2463_v15  ;;  %v2436_v61 = vld [vmem:[%s3884_s7 + $0x98] sm:$0xf0]  ;;  %v2364_v4 = vld [vmem:[%s3884_s7 + $0x8] sm:$0xf0]  ;;  %v2434_v8 = vld [vmem:[%s3884_s7 + $0x90] sm:$0xf] }
 0x174   : > { %1100 = vst [vmem:[%s3521_s26 + $0x40] sm:$0xff] %v1084_v9  ;;  %1356 = vmatmul.bf16.gmra.mxu1 %v1111_v10  ;;  %1414 = vmatmul.bf16.gmra.mxu3 %v1111_v10  ;;  %v2628_v10 = vld [vmem:[%s3884_s7 + $0xc4] sm:$0xf0]  ;;  %v2426_v15 = vld [vmem:[%s3884_s7 + $0x80] sm:$0xf] }
 0x175   : > { %v1066_v14 = vpop.f32.mrf.mxu3  ;;  %1654 = vmatpush.bf16.msrb.mxu0 %v2403_v59  ;;  %1713 = vmatpush.bf16.msrb.mxu2 %v2399_v7  ;;  %v2372_v59 = vld [vmem:[%s3884_s7 + $0x18] sm:$0xf0]  ;;  %v2604_v7 = vld [vmem:[%s3884_s7 + $0x4] sm:$0xf0] }
 0x176   : > { %v3557_v20 = vadd.f32 %v1066_v14, %v1038_v11  ;;  %v1039_v21 = vpop.f32.mrf.mxu2  ;;  %v2388_v14 = vld [vmem:[%s3884_s7 + $0x38] sm:$0xf0]  ;;  %v2375_v62 = vor.u32 %v2605_v57, %v2372_v59 }
 0x177   : > { %v1010_v28 = vpop.f32.mrf.mxu1  ;;  %v1040_v53 = vadd.f32 %v1039_v21, %v3517_v29  ;;  %1743 = vmatpush.bf16.msrb.mxu3 %v2455_v32 }
 0x178   : > { %v1085_v36 = vmax.f32 %v3557_v20, 0.0  ;;  %v1011_v37 = vadd.f32 %v1010_v28, %v982_v19  ;;  %v984_v41 = vpop.f32.mrf.mxu0  ;;  %v2391_v28 = vor.u32 %v2609_v13, %v2388_v14  ;;  %v2428_v13 = vld [vmem:[%s3884_s7 + $0x88] sm:$0xf0] }
 0x179   : > { %v985_v63 = vadd.f32 %v984_v41, %v3510_v23  ;;  %1655 = vmatpush.bf16.msrb.mxu0 %v2395_v16  ;;  %v2620_v16 = vld [vmem:[%s3884_s7 + $0x84] sm:$0xf0] }
 0x17a   : > { %1101 = vst [vmem:[%s3521_s26 + $0x48] sm:$0xff] %v1085_v36  ;;  %v1086_v45 = vmax.f32 %v1011_v37, 0.0  ;;  %1714 = vmatpush.bf16.msrb.mxu2 %v2391_v28  ;;  %v2427_v17 = vor.u32 %v2620_v16, %v2426_v15 }
 0x17b   : > { %1744 = vmatpush.bf16.msrb.mxu3 %v2447_v30 }
 0x17c   : > { %1102 = vst [vmem:[%s3521_s26 + $0x50] sm:$0xff] %v1086_v45  ;;  %v1112_v54 = vpack.c.bf16 %v1086_v45, %v1084_v9  ;;  %v2458_v9 = vld [vmem:[%s3884_s7 + $0xc0] sm:$0xf]  ;;  %v2450_v45 = vld [vmem:[%s3884_s7 + $0xb0] sm:$0xf] }
 0x17d   : > { %v1068_v58 = vpop.f32.mrf.mxu3  ;;  %v2459_v22 = vor.u32 %v2628_v10, %v2458_v9  ;;  %1656 = vmatpush.bf16.msrb.mxu0 %v2387_v33  ;;  %v2451_v47 = vor.u32 %v2626_v46, %v2450_v45  ;;  %v2622_v9 = vld [vmem:[%s3884_s7 + $0x94] sm:$0xf0] }
 0x17e   : > { %v1069_v0 = vadd.f32 %v1068_v58, %v1040_v53  ;;  %1332 = vmatmul.bf16.gmra.mxu0 %v1112_v54  ;;  %1390 = vmatmul.bf16.gmra.mxu2 %v1112_v54  ;;  %v1042_v6 = vpop.f32.mrf.mxu2  ;;  %v2608_v53 = vld [vmem:[%s3884_s7 + $0x24] sm:$0xf0]  ;;  %v2443_v58 = vor.u32 %v2624_v56, %v2442_v55 }
 0x17f   : > { %v1013_v5 = vpop.f32.mrf.mxu1  ;;  %v1043_v31 = vadd.f32 %v1042_v6, %v3517_v29  ;;  %1684 = vmatpush.bf16.msrb.mxu1 %v2459_v22  ;;  %v2379_v54 = vor.u32 %v2608_v53, %v2378_v52  ;;  %v2367_v6 = vor.u32 %v2603_v3, %v2364_v4 }
 0x180   : > { %v1087_v11 = vmax.f32 %v1069_v0, 0.0  ;;  %v1014_v12 = vadd.f32 %v1013_v5, %v985_v63  ;;  %v986_v27 = vpop.f32.mrf.mxu0  ;;  %v2439_v63 = vor.u32 %v2621_v60, %v2436_v61  ;;  %v2370_v0 = vld [vmem:[%s3884_s7 + $0x10] sm:$0xf]  ;;  %v2362_v5 = vld [vmem:[%s3884_s7] sm:$0xf] }
 0x181   : > { %v987_v34 = vadd.f32 %v986_v27, %v3510_v23  ;;  %1657 = vmatpush.bf16.msrb.mxu0 %v2379_v54  ;;  %v2371_v2 = vor.u32 %v2606_v1, %v2370_v0  ;;  %v2363_v10 = vor.u32 %v2604_v7, %v2362_v5 }
 0x182   : > { %1103 = vst [vmem:[%s3521_s26 + $0x58] sm:$0xff] %v1087_v11  ;;  %v1088_v19 = vmax.f32 %v1014_v12, 0.0  ;;  %v1113_v21 = vpack.c.bf16 %v1087_v11, %v1085_v36  ;;  %1745 = vmatpush.bf16.msrb.mxu3 %v2439_v63  ;;  %v2435_v11 = vor.u32 %v2622_v9, %v2434_v8  ;;  %v2619_v12 = vld [vmem:[%s3884_s7 + $0x84] sm:$0xf] }
 0x183   : > { %1685 = vmatpush.bf16.msrb.mxu1 %v2451_v47  ;;  %v2431_v14 = vor.u32 %v2619_v12, %v2428_v13 }
 0x184   : > { %1104 = vst [vmem:[%s3521_s26 + $0x60] sm:$0xff] %v1088_v19  ;;  %1361 = vmatmul.bf16.gmra.mxu1 %v1113_v21  ;;  %1419 = vmatmul.bf16.gmra.mxu3 %v1113_v21 }
 0x185   : > { %v1071_v20 = vpop.f32.mrf.mxu3  ;;  %1658 = vmatpush.bf16.msrb.mxu0 %v2371_v2 }
 0x186   : > { %v1072_v35 = vadd.f32 %v1071_v20, %v1043_v31  ;;  %v1044_v39 = vpop.f32.mrf.mxu2  ;;  %1746 = vmatpush.bf16.msrb.mxu3 %v2431_v14 }
 0x187   : > { %v1015_v36 = vpop.f32.mrf.mxu1  ;;  %v1045_v41 = vadd.f32 %v1044_v39, %v3517_v29  ;;  %v2607_v29 = vld [vmem:[%s3884_s7 + $0x24] sm:$0xf]  ;;  %1686 = vmatpush.bf16.msrb.mxu1 %v2443_v58 }
 0x188   : > { %v1089_v37 = vmax.f32 %v1072_v35, 0.0  ;;  %v1016_v38 = vadd.f32 %v1015_v36, %v987_v34  ;;  %v2383_v51 = vor.u32 %v2607_v29, %v2380_v48 }
 0x189   : > { %1659 = vmatpush.bf16.msrb.mxu0 %v2363_v10 }
 0x18a   : > { %1105 = vst [vmem:[%s3521_s26 + $0x68] sm:$0xff] %v1089_v37  ;;  %v1090_v40 = vmax.f32 %v1016_v38, 0.0  ;;  %1715 = vmatpush.bf16.msrb.mxu2 %v2383_v51 }
 0x18b   : > { %1687 = vmatpush.bf16.msrb.mxu1 %v2435_v11 }
 0x18c   : > { %1106 = vst [vmem:[%s3521_s26 + $0x70] sm:$0xff] %v1090_v40  ;;  %v1114_v42 = vpack.c.bf16 %v1090_v40, %v1088_v19  ;;  %v1148_v19 = vld [vmem:[%s3883_s6] sm:$0x3] }
 0x18d   : > { %v1073_v43 = vpop.f32.mrf.mxu3  ;;  %v3756_v24 = vperm.slane %v1148_v19, 0  ;;  %v3759_v20 = vperm.slane %v1148_v19, 1 }
 0x18e   : > { %v1074_v44 = vadd.f32 %v1073_v43, %v1045_v41  ;;  %1337 = vmatmul.bf16.gmra.mxu0 %v1114_v42  ;;  %1395 = vmatmul.bf16.gmra.mxu2 %v1114_v42 }
 0x18f   : > { %1716 = vmatpush.bf16.msrb.mxu2 %v2375_v62  ;;  %1688 = vmatpush.bf16.msrb.mxu1 %v2427_v17 }
 0x190   : > { %v1091_v23 = vmax.f32 %v1074_v44, 0.0 }
 0x192   : > { %1107 = vst [vmem:[%s3521_s26 + $0x78] sm:$0xff] %v1091_v23  ;;  %v1115_v26 = vpack.c.bf16 %v1091_v23, %v1089_v37 }
 0x193   : > { %1717 = vmatpush.bf16.msrb.mxu2 %v2367_v6 }
 0x194   : > { %1366 = vmatmul.bf16.gmra.mxu1 %v1115_v26  ;;  %1424 = vmatmul.bf16.gmra.mxu3 %v1115_v26 }
 0x1db   : > { %v1323_v18 = vpop.f32.mrf.mxu0 }
 0x1dc   : > { %v1324_v27 = vadd.f32 %v1323_v18, %v3756_v24 }
 0x1e1   : > { %v1352_v21 = vpop.f32.mrf.mxu1  ;;  %v1381_v22 = vpop.f32.mrf.mxu2 }
 0x1e2   : > { %v1353_v31 = vadd.f32 %v1352_v21, %v1324_v27  ;;  %v1382_v38 = vadd.f32 %v1381_v22, %v3759_v20 }
 0x1e3   : > { %v1325_v25 = vpop.f32.mrf.mxu0 }
 0x1e4   : > { %v1326_v32 = vadd.f32 %v1325_v25, %v3756_v24  ;;  %v1430_v37 = vmax.f32 %v1353_v31, 0.0 }
 0x1e7   : > { %v1410_v28 = vpop.f32.mrf.mxu3 }
 0x1e8   : > { %v1411_v40 = vadd.f32 %v1410_v28, %v1382_v38 }
 0x1e9   : > { %v1354_v33 = vpop.f32.mrf.mxu1  ;;  %v1383_v34 = vpop.f32.mrf.mxu2 }
 0x1ea   : > { %v1355_v35 = vadd.f32 %v1354_v33, %v1326_v32  ;;  %v1384_v42 = vadd.f32 %v1383_v34, %v3759_v20  ;;  %v1431_v45 = vmax.f32 %v1411_v40, 0.0 }
 0x1eb   : > { %v1328_v36 = vpop.f32.mrf.mxu0 }
 0x1ec   : > { %v1432_v39 = vmax.f32 %v1355_v35, 0.0  ;;  %v1329_v48 = vadd.f32 %v1328_v36, %v3756_v24 }
 0x1ee   : > { %v1446_v41 = vpack.c.bf16 %v1432_v39, %v1430_v37 }
 0x1ef   : > { %v1412_v43 = vpop.f32.mrf.mxu3 }
 0x1f0   : > { %v1413_v44 = vadd.f32 %v1412_v43, %v1384_v42  ;;  %1660 = vmatmul.bf16.vlgmr.msrb.gmra.mxu0 %v1446_v41  ;;  %1718 = vmatmul.bf16.vlgmr.msrb.gmra.mxu2 %v1446_v41 }
 0x1f1   : > { %v1357_v23 = vpop.f32.mrf.mxu1  ;;  %v1386_v26 = vpop.f32.mrf.mxu2 }
 0x1f2   : > { %v1433_v46 = vmax.f32 %v1413_v44, 0.0  ;;  %v1358_v50 = vadd.f32 %v1357_v23, %v1329_v48  ;;  %v1387_v56 = vadd.f32 %v1386_v26, %v3759_v20 }
 0x1f3   : > { %v1330_v29 = vpop.f32.mrf.mxu0 }
 0x1f4   : > { %v1447_v47 = vpack.c.bf16 %v1433_v46, %v1431_v45  ;;  %v1331_v51 = vadd.f32 %v1330_v29, %v3756_v24  ;;  %v1434_v55 = vmax.f32 %v1358_v50, 0.0 }
 0x1f6   : > { %1689 = vmatmul.bf16.vlgmr.msrb.gmra.mxu1 %v1447_v47  ;;  %1747 = vmatmul.bf16.vlgmr.msrb.gmra.mxu3 %v1447_v47 }
 0x1f7   : > { %v1415_v49 = vpop.f32.mrf.mxu3 }
 0x1f8   : > { %v1416_v58 = vadd.f32 %v1415_v49, %v1387_v56 }
 0x1f9   : > { %v1359_v30 = vpop.f32.mrf.mxu1  ;;  %v1388_v52 = vpop.f32.mrf.mxu2 }
 0x1fa   : > { %v1360_v53 = vadd.f32 %v1359_v30, %v1331_v51  ;;  %v1389_v60 = vadd.f32 %v1388_v52, %v3759_v20  ;;  %v1435_v1 = vmax.f32 %v1416_v58, 0.0 }
 0x1fb   : > { %v1333_v54 = vpop.f32.mrf.mxu0 }
 0x1fc   : > { %v1436_v57 = vmax.f32 %v1360_v53, 0.0  ;;  %v1334_v5 = vadd.f32 %v1333_v54, %v3756_v24 }
 0x1fe   : > { %v1448_v59 = vpack.c.bf16 %v1436_v57, %v1434_v55 }
 0x1ff   : > { %v1417_v61 = vpop.f32.mrf.mxu3 }
 0x200   : > { %v1418_v62 = vadd.f32 %v1417_v61, %v1389_v60  ;;  %1665 = vmatmul.bf16.gmra.mxu0 %v1448_v59  ;;  %1723 = vmatmul.bf16.gmra.mxu2 %v1448_v59 }
 0x201   : > { %v1362_v63 = vpop.f32.mrf.mxu1  ;;  %v1391_v0 = vpop.f32.mrf.mxu2 }
 0x202   : > { %v1437_v2 = vmax.f32 %v1418_v62, 0.0  ;;  %v1363_v7 = vadd.f32 %v1362_v63, %v1334_v5  ;;  %v1392_v14 = vadd.f32 %v1391_v0, %v3759_v20 }
 0x203   : > { %v1335_v3 = vpop.f32.mrf.mxu0 }
 0x204   : > { %v1449_v4 = vpack.c.bf16 %v1437_v2, %v1435_v1  ;;  %v1336_v8 = vadd.f32 %v1335_v3, %v3756_v24  ;;  %v1438_v13 = vmax.f32 %v1363_v7, 0.0 }
 0x206   : > { %1694 = vmatmul.bf16.gmra.mxu1 %v1449_v4  ;;  %1752 = vmatmul.bf16.gmra.mxu3 %v1449_v4 }
 0x207   : > { %v1420_v6 = vpop.f32.mrf.mxu3 }
 0x208   : > { %v1421_v16 = vadd.f32 %v1420_v6, %v1392_v14 }
 0x209   : > { %v1364_v9 = vpop.f32.mrf.mxu1  ;;  %v1393_v10 = vpop.f32.mrf.mxu2 }
 0x20a   : > { %v1365_v11 = vadd.f32 %v1364_v9, %v1336_v8  ;;  %v1394_v18 = vadd.f32 %v1393_v10, %v3759_v20  ;;  %v1439_v27 = vmax.f32 %v1421_v16, 0.0 }
 0x20b   : > { %v1338_v12 = vpop.f32.mrf.mxu0 }
 0x20c   : > { %v1440_v15 = vmax.f32 %v1365_v11, 0.0  ;;  %v1339_v33 = vadd.f32 %v1338_v12, %v3756_v24 }
 0x20e   : > { %v1450_v17 = vpack.c.bf16 %v1440_v15, %v1438_v13 }
 0x20f   : > { %v1422_v19 = vpop.f32.mrf.mxu3 }
 0x210   : > { %v1423_v21 = vadd.f32 %v1422_v19, %v1394_v18  ;;  %1670 = vmatmul.bf16.gmra.mxu0 %v1450_v17  ;;  %1728 = vmatmul.bf16.gmra.mxu2 %v1450_v17 }
 0x211   : > { %v1367_v22 = vpop.f32.mrf.mxu1  ;;  %v1396_v25 = vpop.f32.mrf.mxu2 }
 0x212   : > { %v1441_v28 = vmax.f32 %v1423_v21, 0.0  ;;  %v1368_v35 = vadd.f32 %v1367_v22, %v1339_v33  ;;  %v1397_v41 = vadd.f32 %v1396_v25, %v3759_v20 }
 0x213   : > { %v1340_v32 = vpop.f32.mrf.mxu0 }
 0x214   : > { %v1451_v31 = vpack.c.bf16 %v1441_v28, %v1439_v27  ;;  %v1341_v36 = vadd.f32 %v1340_v32, %v3756_v24  ;;  %v1442_v40 = vmax.f32 %v1368_v35, 0.0 }
 0x216   : > { %1699 = vmatmul.bf16.gmra.mxu1 %v1451_v31  ;;  %1757 = vmatmul.bf16.gmra.mxu3 %v1451_v31 }
 0x217   : > { %v1425_v34 = vpop.f32.mrf.mxu3 }
 0x218   : > { %v1426_v43 = vadd.f32 %v1425_v34, %v1397_v41 }
 0x219   : > { %v1369_v37 = vpop.f32.mrf.mxu1  ;;  %v1398_v39 = vpop.f32.mrf.mxu2 }
 0x21a   : > { %v1370_v38 = vadd.f32 %v1369_v37, %v1341_v36  ;;  %v1399_v23 = vadd.f32 %v1398_v39, %v3759_v20  ;;  %v1443_v24 = vmax.f32 %v1426_v43, 0.0 }
 0x21c   : > { %v1444_v42 = vmax.f32 %v1370_v38, 0.0 }
 0x21e   : > { %v1452_v44 = vpack.c.bf16 %v1444_v42, %v1442_v40 }
 0x21f   : > { %v1427_v26 = vpop.f32.mrf.mxu3 }
 0x220   : > { %v1428_v45 = vadd.f32 %v1427_v26, %v1399_v23  ;;  %1675 = vmatmul.bf16.gmra.mxu0 %v1452_v44  ;;  %1733 = vmatmul.bf16.gmra.mxu2 %v1452_v44 }
 0x222   : > { %v1445_v46 = vmax.f32 %v1428_v45, 0.0 }
 0x224   : > { %v1453_v29 = vpack.c.bf16 %v1445_v46, %v1443_v24 }
 0x226   : > { %1704 = vmatmul.bf16.gmra.mxu1 %v1453_v29  ;;  %1762 = vmatmul.bf16.gmra.mxu3 %v1453_v29 }
 0x227   : > { %2712 = shalt.err (!%p2709_p3)
}
 0x228   : > { %s2781_s26 = smov 256   ;;  %s2782_s30 = smov 16   ;;  %v1486_v20 = vld [vmem:[%s3885_s8] sm:$0x3] }
 0x229   : > { %2639 = dma.vmem_to_hbm [thread:$0]  (%p2876_p5), %s1820_s28, 2048, %s1822_s11, %s1801_s12, %s2781_s26, %s2781_s26, %s2782_s30   ;;  %v3800_v48 = vperm.slane %v1486_v20, 0  ;;  %v3803_v52 = vperm.slane %v1486_v20, 1 }
 0x22a   : > { %s3900_s1 = sshll.u32 %s3513_s29, 7  ;;  %s1836_s11 = scalar_lea.hbm %s3887_s10, %s2636_s22 }
 0x22b   : > { %s3807_s2 = scalar_lea.vmem [#allocation4], %s3900_s1  ;;  %s1839_s18 = sshll.u32 %s1836_s11, 4  ;;  %s1840_s18 = int_to_ptr.hbm [resolvable:$true] %s1839_s18 }
 0x22c   : > { %s1837_s12 = sshll.u32 %s3807_s2, 4  ;;  %s1806_s0 = scalar_lea.sflag [#allocation5], %s3513_s29  ;;  %s1838_s12 = int_to_ptr.vmem [resolvable:$true] %s1837_s12 }
 0x22d   : > { %s2727_s21 = sshra.s32 %s1840_s18, 4  ;;  %s2733_s20 = scalar_lea.hbm %s3887_s10, 256  ;;  %s2728_s21 = int_to_ptr.hbm [resolvable:$true] %s2727_s21 }
 0x22e   : > { %s2729_s17 = scalar_lea.hbm %s2728_s21, 128  ;;  %p2734_p9 = scmp.lt.s32.totalorder %s2728_s21, %s3887_s10 }
 0x22f   : > { %p2730_p4 = scmp.ne.s32.totalorder %s2728_s21, %s2729_s17  ;;  %p2735_p10 = scmp.lt.s32.totalorder %s2733_s20, %s2729_s17 }
 0x231   : > { %p2731_p7 = pnand %p2730_p4, %p2876_p5  ;;  %p2736_p11 = por %p2735_p10, %p2734_p9 }
 0x233   : > { %p2732_p8 = pneg %p2731_p7 }
 0x235   : > { %p2737_p12 = pnand %p2736_p11, %p2732_p8 }
 0x26d   : > { %v1661_v47 = vpop.f32.mrf.mxu0 }
 0x26e   : > { %v1662_v49 = vadd.f32 %v1661_v47, %v3800_v48 }
 0x273   : > { %v1690_v50 = vpop.f32.mrf.mxu1  ;;  %v1719_v51 = vpop.f32.mrf.mxu2 }
 0x274   : > { %v1691_v30 = vadd.f32 %v1690_v50, %v1662_v49  ;;  %v1720_v55 = vadd.f32 %v1719_v51, %v3803_v52 }
 0x275   : > { %v1663_v53 = vpop.f32.mrf.mxu0 }
 0x276   : > { %v1768_v54 = vmax.f32 %v1691_v30, 0.0  ;;  %v1664_v57 = vadd.f32 %v1663_v53, %v3800_v48 }
 0x278   : > { %1784 = vst [vmem:[%s3807_s2] sm:$0xff] %v1768_v54 }
 0x279   : > { %v1748_v56 = vpop.f32.mrf.mxu3 }
 0x27a   : > { %v1749_v58 = vadd.f32 %v1748_v56, %v1720_v55 }
 0x27b   : > { %v1692_v59 = vpop.f32.mrf.mxu1  ;;  %v1721_v60 = vpop.f32.mrf.mxu2 }
 0x27c   : > { %v1769_v61 = vmax.f32 %v1749_v58, 0.0  ;;  %v1693_v62 = vadd.f32 %v1692_v59, %v1664_v57  ;;  %v1722_v1 = vadd.f32 %v1721_v60, %v3803_v52 }
 0x27d   : > { %v1666_v63 = vpop.f32.mrf.mxu0 }
 0x27e   : > { %1785 = vst [vmem:[%s3807_s2 + $0x8] sm:$0xff] %v1769_v61  ;;  %v1770_v0 = vmax.f32 %v1693_v62, 0.0  ;;  %v1667_v3 = vadd.f32 %v1666_v63, %v3800_v48 }
 0x280   : > { %1786 = vst [vmem:[%s3807_s2 + $0x10] sm:$0xff] %v1770_v0 }
 0x281   : > { %v1750_v2 = vpop.f32.mrf.mxu3 }
 0x282   : > { %v1751_v4 = vadd.f32 %v1750_v2, %v1722_v1 }
 0x283   : > { %v1695_v5 = vpop.f32.mrf.mxu1  ;;  %v1724_v6 = vpop.f32.mrf.mxu2 }
 0x284   : > { %v1771_v7 = vmax.f32 %v1751_v4, 0.0  ;;  %v1696_v8 = vadd.f32 %v1695_v5, %v1667_v3  ;;  %v1725_v11 = vadd.f32 %v1724_v6, %v3803_v52 }
 0x285   : > { %v1668_v9 = vpop.f32.mrf.mxu0 }
 0x286   : > { %1787 = vst [vmem:[%s3807_s2 + $0x18] sm:$0xff] %v1771_v7  ;;  %v1772_v10 = vmax.f32 %v1696_v8, 0.0  ;;  %v1669_v13 = vadd.f32 %v1668_v9, %v3800_v48 }
 0x288   : > { %1788 = vst [vmem:[%s3807_s2 + $0x20] sm:$0xff] %v1772_v10 }
 0x289   : > { %v1753_v12 = vpop.f32.mrf.mxu3 }
 0x28a   : > { %v1754_v14 = vadd.f32 %v1753_v12, %v1725_v11 }
 0x28b   : > { %v1697_v15 = vpop.f32.mrf.mxu1  ;;  %v1726_v16 = vpop.f32.mrf.mxu2 }
 0x28c   : > { %v1773_v17 = vmax.f32 %v1754_v14, 0.0  ;;  %v1698_v18 = vadd.f32 %v1697_v15, %v1669_v13  ;;  %v1727_v22 = vadd.f32 %v1726_v16, %v3803_v52 }
 0x28d   : > { %v1671_v19 = vpop.f32.mrf.mxu0 }
 0x28e   : > { %1789 = vst [vmem:[%s3807_s2 + $0x28] sm:$0xff] %v1773_v17  ;;  %v1774_v21 = vmax.f32 %v1698_v18, 0.0  ;;  %v1672_v27 = vadd.f32 %v1671_v19, %v3800_v48 }
 0x290   : > { %1790 = vst [vmem:[%s3807_s2 + $0x30] sm:$0xff] %v1774_v21 }
 0x291   : > { %v1755_v25 = vpop.f32.mrf.mxu3 }
 0x292   : > { %v1756_v28 = vadd.f32 %v1755_v25, %v1727_v22 }
 0x293   : > { %v1700_v31 = vpop.f32.mrf.mxu1  ;;  %v1729_v32 = vpop.f32.mrf.mxu2 }
 0x294   : > { %v1775_v33 = vmax.f32 %v1756_v28, 0.0  ;;  %v1701_v34 = vadd.f32 %v1700_v31, %v1672_v27  ;;  %v1730_v37 = vadd.f32 %v1729_v32, %v3803_v52 }
 0x295   : > { %v1673_v35 = vpop.f32.mrf.mxu0 }
 0x296   : > { %1791 = vst [vmem:[%s3807_s2 + $0x38] sm:$0xff] %v1775_v33  ;;  %v1776_v36 = vmax.f32 %v1701_v34, 0.0  ;;  %v1674_v39 = vadd.f32 %v1673_v35, %v3800_v48 }
 0x298   : > { %1792 = vst [vmem:[%s3807_s2 + $0x40] sm:$0xff] %v1776_v36 }
 0x299   : > { %v1758_v38 = vpop.f32.mrf.mxu3 }
 0x29a   : > { %v1759_v40 = vadd.f32 %v1758_v38, %v1730_v37 }
 0x29b   : > { %v1702_v41 = vpop.f32.mrf.mxu1  ;;  %v1731_v42 = vpop.f32.mrf.mxu2 }
 0x29c   : > { %v1777_v43 = vmax.f32 %v1759_v40, 0.0  ;;  %v1703_v44 = vadd.f32 %v1702_v41, %v1674_v39  ;;  %v1732_v45 = vadd.f32 %v1731_v42, %v3803_v52 }
 0x29d   : > { %v1676_v23 = vpop.f32.mrf.mxu0 }
 0x29e   : > { %1793 = vst [vmem:[%s3807_s2 + $0x48] sm:$0xff] %v1777_v43  ;;  %v1778_v26 = vmax.f32 %v1703_v44, 0.0  ;;  %v1677_v46 = vadd.f32 %v1676_v23, %v3800_v48 }
 0x2a0   : > { %1794 = vst [vmem:[%s3807_s2 + $0x50] sm:$0xff] %v1778_v26 }
 0x2a1   : > { %v1760_v24 = vpop.f32.mrf.mxu3 }
 0x2a2   : > { %v1761_v29 = vadd.f32 %v1760_v24, %v1732_v45 }
 0x2a3   : > { %v1705_v20 = vpop.f32.mrf.mxu1  ;;  %v1734_v47 = vpop.f32.mrf.mxu2 }
 0x2a4   : > { %v1779_v49 = vmax.f32 %v1761_v29, 0.0  ;;  %v1706_v50 = vadd.f32 %v1705_v20, %v1677_v46  ;;  %v1735_v53 = vadd.f32 %v1734_v47, %v3803_v52 }
 0x2a5   : > { %v1678_v30 = vpop.f32.mrf.mxu0 }
 0x2a6   : > { %1795 = vst [vmem:[%s3807_s2 + $0x58] sm:$0xff] %v1779_v49  ;;  %v1780_v51 = vmax.f32 %v1706_v50, 0.0  ;;  %v1679_v55 = vadd.f32 %v1678_v30, %v3800_v48 }
 0x2a8   : > { %1796 = vst [vmem:[%s3807_s2 + $0x60] sm:$0xff] %v1780_v51 }
 0x2a9   : > { %v1763_v54 = vpop.f32.mrf.mxu3 }
 0x2aa   : > { %v1764_v56 = vadd.f32 %v1763_v54, %v1735_v53 }
 0x2ab   : > { %v1707_v57 = vpop.f32.mrf.mxu1  ;;  %v1736_v60 = vpop.f32.mrf.mxu2 }
 0x2ac   : > { %v1781_v58 = vmax.f32 %v1764_v56, 0.0  ;;  %v1708_v59 = vadd.f32 %v1707_v57, %v1679_v55  ;;  %v1737_v62 = vadd.f32 %v1736_v60, %v3803_v52 }
 0x2ae   : > { %1797 = vst [vmem:[%s3807_s2 + $0x68] sm:$0xff] %v1781_v58  ;;  %v1782_v61 = vmax.f32 %v1708_v59, 0.0 }
 0x2b0   : > { %1798 = vst [vmem:[%s3807_s2 + $0x70] sm:$0xff] %v1782_v61 }
 0x2b1   : > { %v1765_v63 = vpop.f32.mrf.mxu3 }
 0x2b2   : > { %v1766_v48 = vadd.f32 %v1765_v63, %v1737_v62 }
 0x2b4   : > { %v1783_v0 = vmax.f32 %v1766_v48, 0.0 }
 0x2b6   : > { %1799 = vst [vmem:[%s3807_s2 + $0x78] sm:$0xff] %v1783_v0 }
 0x2b7   : > { %2740 = shalt.err (!%p2737_p12)
}
 0x2b8   : > { %2640 = dma.vmem_to_hbm [thread:$0]  (%p2876_p5), %s1838_s12, 2048, %s1840_s18, %s1806_s0, %s2781_s26, %s2781_s26, %s2782_s30  }
 0x2b9 PF: > { %p2650_p13 = scmp.ge.s32.totalorder %s2779_s16, 2  ;;  %s1854_s29 = sand.u32 1, %s2767_s13  }
 0x2ba   : > { %s1855_s2 = scalar_lea.sflag [#allocation3], %s1854_s29 }
 0x2bb   : > { %p2644_p0 = pnand %p2650_p13, %p2880_p6 }
 0x2bd   : > { %p2645_p1 = pneg %p2644_p0 }
 0x2bf   : > { %2758 = dma.done.wait (%p2645_p1), %s1855_s2, 2048  }
 0x2c0   : > { %2760 = vsyncadd (%p2645_p1), %s1855_s2, 4294965248  ;;  %s1865_s3 = scalar_lea.sflag [#allocation5], %s1854_s29 }
 0x2c1   : > { %2762 = dma.done.wait (%p2645_p1), %s1865_s3, 2048  }
 0x2c2   : > { %2764 = vsyncadd (%p2645_p1), %s1865_s3, 4294965248  ;;  %s3901_s23 = sld [smem:[#allocation8_spill]]  ;;  %p24_p5 = scmp.ge.s32.totalorder %s2863_s19, 4  }
 0x2c3   : > { %s3902_s13 = smov %s2771_s14  ;;  %s3903_s14 = smov %s2775_s15 }
 0x2c4   : > { %s3905_s16 = smov %s2863_s19  ;;  %26 = sbr.rel (!%p24_p5) target bundleno = 10 (0xa), region = 108 }
 0x2c8   : > { %s3904_s15 = smov %s3901_s23 }
 0x2c9   :  { %1871 = vsyncpa [#allocation3], 1 }
 0x2ca   :  { %1873 = vsyncpa [#allocation3 + $0x1], 1 }
 0x2cb   :  { %1874 = vsyncpa [#allocation5], 1 }
 0x2cc   :  { %1876 = vsyncpa [#allocation5 + $0x1], 1 }

</bundles_post_ra>
